<compile_context>
chip_gen: v7x
topology: tpu7x:2x2x1
jax: 0.10.0
libtpu: 0.0.40
codegen_flags: <defaults>
</compile_context>

<pallas_src>
import jax
import jax.numpy as jnp
from jax.experimental import pallas as pl
from jax.experimental.pallas import tpu as pltpu

IN_DIM = 84 * 84      # 7056  (divisible by 16 -> clean bf16 sublane tiling)
H1 = 128
H2 = 64
OUT_PAD = 128         # lane-dense padded output width (num_actions <= 128)

# Packed constant-buffer row offsets (all multiples of 8 -> tile-aligned slices)
B1_ROW = 0                      # row 0       : b1 (128 lanes)
W2_ROW = 8                      # rows 8..135 : W2 (128 x 64, zero-padded to 128 lanes)
B2_ROW = W2_ROW + H1            # row 136     : b2
W3_ROW = B2_ROW + 8             # rows 144..271: W3 (64 x A, zero-padded to 128 x 128)
B3_ROW = W3_ROW + H1            # row 272     : b3
CONST_ROWS = B3_ROW + 8         # 280 rows total


def mlp_kernel(x_ref, w1_ref, c_ref, o_ref):
    # fc1: bf16 x bf16 on the MXU, f32 accumulate over the full K=7056.
    x = x_ref[...].astype(jnp.bfloat16)
    h1 = jnp.dot(x, w1_ref[...], preferred_element_type=jnp.float32)
    h1 = jnp.maximum(h1 + c_ref[B1_ROW:B1_ROW + 1, :], 0.0)

    # fc2 (+relu): tiny 128x128 (zero-padded) f32 matmul.
    h2 = jnp.dot(h1, c_ref[W2_ROW:W2_ROW + H1, :],
                 preferred_element_type=jnp.float32)
    h2 = jnp.maximum(h2 + c_ref[B2_ROW:B2_ROW + 1, :], 0.0)

    # fc3 (no activation). Padded W3 rows 64..127 are zero, matching the
    # zero columns of h2, so the padded contraction is exact.
    out = jnp.dot(h2, c_ref[W3_ROW:W3_ROW + H1, :],
                  preferred_element_type=jnp.float32)
    o_ref[...] = out + c_ref[B3_ROW:B3_ROW + 1, :]


def nn_forward(x, packed_params, num_actions):
    """x: (B, 7056) float32. Returns (B, num_actions) float32."""
    w1, consts = packed_params           # w1: (IN_DIM, H1) bf16, consts: (280, 128) f32
    B, F = x.shape
    assert F == IN_DIM
    assert num_actions <= OUT_PAD

    # bf16 packs 16 rows per sublane group -> pad batch to a multiple of 16.
    Bp = max(16, ((B + 15) // 16) * 16)
    xp = jnp.pad(x, ((0, Bp - B), (0, 0)))

    out = pl.pallas_call(
        mlp_kernel,
        out_shape=jax.ShapeDtypeStruct((Bp, OUT_PAD), jnp.float32),
        grid_spec=pltpu.PrefetchScalarGridSpec(
            num_scalar_prefetch=0,
            grid=(1,),
            in_specs=[
                pl.BlockSpec((Bp, IN_DIM), lambda i: (0, 0)),       # x (f32)
                pl.BlockSpec((IN_DIM, H1), lambda i: (0, 0)),       # W1 (bf16)
                pl.BlockSpec((CONST_ROWS, OUT_PAD), lambda i: (0, 0)),  # packed consts
            ],
            out_specs=pl.BlockSpec((Bp, OUT_PAD), lambda i: (0, 0)),
        ),
        compiler_params=pltpu.CompilerParams(
            dimension_semantics=("arbitrary",),
        ),
    )(xp, w1, consts)

    return out[:B, :num_actions]


def init_params(key, num_actions):
    """Raw f32 params matching the PyTorch shapes/init intent.

    fc1, fc2: kaiming_normal (std = sqrt(2/fan_in)), zero bias.
    fc3:      xavier_normal  (std = sqrt(2/(fan_in+fan_out))), zero bias.
    Weights stored as (in, out) = torch weight transposed.
    """
    k1, k2, k3 = jax.random.split(key, 3)
    w1 = jax.random.normal(k1, (IN_DIM, H1), jnp.float32) * jnp.sqrt(2.0 / IN_DIM)
    w2 = jax.random.normal(k2, (H1, H2), jnp.float32) * jnp.sqrt(2.0 / H1)
    w3 = jax.random.normal(k3, (H2, num_actions), jnp.float32) * jnp.sqrt(
        2.0 / (H2 + num_actions))
    b1 = jnp.zeros((H1,), jnp.float32)
    b2 = jnp.zeros((H2,), jnp.float32)
    b3 = jnp.zeros((num_actions,), jnp.float32)
    return (w1, b1, w2, b2, w3, b3)


def pack_params(raw, num_actions):
    """Kernel-side storage: bf16 W1 + one packed f32 constant buffer."""
    w1, b1, w2, b2, w3, b3 = raw
    w1_bf16 = w1.astype(jnp.bfloat16)

    consts = jnp.zeros((CONST_ROWS, OUT_PAD), jnp.float32)
    consts = consts.at[B1_ROW, :H1].set(b1)
    consts = consts.at[W2_ROW:W2_ROW + H1, :H2].set(w2)
    consts = consts.at[B2_ROW, :H2].set(b2)
    consts = consts.at[W3_ROW:W3_ROW + H2, :num_actions].set(w3)
    consts = consts.at[B3_ROW, :num_actions].set(b3)
    return (w1_bf16, consts)


def reference_forward(x, raw):
    """Pure-JAX reference with identical bf16 casting of x / W1."""
    w1, b1, w2, b2, w3, b3 = raw
    xb = x.astype(jnp.bfloat16)
    w1b = w1.astype(jnp.bfloat16)
    h1 = jnp.maximum(
        jnp.dot(xb, w1b, preferred_element_type=jnp.float32) + b1, 0.0)
    h2 = jnp.maximum(
        jnp.dot(h1, w2, preferred_element_type=jnp.float32) + b2, 0.0)
    return jnp.dot(h2, w3, preferred_element_type=jnp.float32) + b3


if __name__ == "__main__":
    num_actions = 6
    batch = 4

    key = jax.random.PRNGKey(0)
    kx, kp = jax.random.split(key)
    x = jax.random.normal(kx, (batch, IN_DIM), jnp.float32)
    raw = init_params(kp, num_actions)
    packed = pack_params(raw, num_actions)

    out = nn_forward(x, packed, num_actions)
    out = jax.block_until_ready(out)

    ref = reference_forward(x, raw)
    assert out.shape == (batch, num_actions)
    assert jnp.allclose(out, ref, atol=2e-3, rtol=2e-3), "mismatch vs JAX reference"

    print("KERNEL_OK")
</pallas_src>

<mosaic_0001>
module attributes {stable_mosaic.version = 11 : i64} {
  func.func @mlp_kernel(%arg0: i32, %arg1: memref<16x7056xf32, #tpu.memory_space<vmem>>, %arg2: memref<7056x128xbf16, #tpu.memory_space<vmem>>, %arg3: memref<280x128xf32, #tpu.memory_space<vmem>>, %arg4: memref<16x128xf32, #tpu.memory_space<vmem>>) attributes {dimension_semantics = [#tpu.dimension_semantics<arbitrary>], iteration_bounds = array<i64: 1>, scalar_prefetch = 0 : i64, scratch_operands = 0 : i64, tpu.core_type = #tpu.core_type<tc>, window_params = [{pipeline_mode = #tpu.pipeline_mode<synchronous>, transform_indices = @transform_0, window_bounds = array<i64: 16, 7056>}, {pipeline_mode = #tpu.pipeline_mode<synchronous>, transform_indices = @transform_1, window_bounds = array<i64: 7056, 128>}, {pipeline_mode = #tpu.pipeline_mode<synchronous>, transform_indices = @transform_2, window_bounds = array<i64: 280, 128>}, {pipeline_mode = #tpu.pipeline_mode<synchronous>, transform_indices = @transform_3, window_bounds = array<i64: 16, 128>}]} {
    %c0 = arith.constant 0 : index
    %c0_0 = arith.constant 0 : index
    %0 = vector.load %arg1[%c0, %c0_0] : memref<16x7056xf32, #tpu.memory_space<vmem>>, vector<16x7056xf32>
    %1 = arith.truncf %0 : vector<16x7056xf32> to vector<16x7056xbf16>
    %c0_1 = arith.constant 0 : index
    %c0_2 = arith.constant 0 : index
    %2 = vector.load %arg2[%c0_1, %c0_2] : memref<7056x128xbf16, #tpu.memory_space<vmem>>, vector<7056x128xbf16>
    %cst = arith.constant dense<0.000000e+00> : vector<16x128xf32>
    %3 = tpu.matmul %1, %2, %cst {dimension_numbers = #tpu.dot_dimension_numbers<[1], [0], [0], [1], [0, 0, 1, 1], [], []>} : vector<16x7056xbf16>, vector<7056x128xbf16>, vector<16x128xf32> -> vector<16x128xf32>
    %c0_3 = arith.constant 0 : index
    %c0_4 = arith.constant 0 : index
    %4 = vector.load %arg3[%c0_3, %c0_4] : memref<280x128xf32, #tpu.memory_space<vmem>>, vector<1x128xf32>
    %5 = vector.broadcast %4 : vector<1x128xf32> to vector<16x128xf32>
    %6 = arith.addf %3, %5 : vector<16x128xf32>
    %cst_5 = arith.constant 0.000000e+00 : f32
    %7 = vector.broadcast %cst_5 : f32 to vector<16x128xf32>
    %8 = arith.maximumf %6, %7 : vector<16x128xf32>
    %c8 = arith.constant 8 : index
    %c0_6 = arith.constant 0 : index
    %9 = vector.load %arg3[%c8, %c0_6] : memref<280x128xf32, #tpu.memory_space<vmem>>, vector<128x128xf32>
    %cst_7 = arith.constant dense<0.000000e+00> : vector<16x128xf32>
    %10 = tpu.matmul %8, %9, %cst_7 {dimension_numbers = #tpu.dot_dimension_numbers<[1], [0], [0], [1], [0, 0, 1, 1], [], []>} : vector<16x128xf32>, vector<128x128xf32>, vector<16x128xf32> -> vector<16x128xf32>
    %c136 = arith.constant 136 : index
    %c0_8 = arith.constant 0 : index
    %11 = vector.load %arg3[%c136, %c0_8] : memref<280x128xf32, #tpu.memory_space<vmem>>, vector<1x128xf32>
    %12 = vector.broadcast %11 : vector<1x128xf32> to vector<16x128xf32>
    %13 = arith.addf %10, %12 : vector<16x128xf32>
    %cst_9 = arith.constant 0.000000e+00 : f32
    %14 = vector.broadcast %cst_9 : f32 to vector<16x128xf32>
    %15 = arith.maximumf %13, %14 : vector<16x128xf32>
    %c144 = arith.constant 144 : index
    %c0_10 = arith.constant 0 : index
    %16 = vector.load %arg3[%c144, %c0_10] : memref<280x128xf32, #tpu.memory_space<vmem>>, vector<128x128xf32>
    %cst_11 = arith.constant dense<0.000000e+00> : vector<16x128xf32>
    %17 = tpu.matmul %15, %16, %cst_11 {dimension_numbers = #tpu.dot_dimension_numbers<[1], [0], [0], [1], [0, 0, 1, 1], [], []>} : vector<16x128xf32>, vector<128x128xf32>, vector<16x128xf32> -> vector<16x128xf32>
    %c272 = arith.constant 272 : index
    %c0_12 = arith.constant 0 : index
    %18 = vector.load %arg3[%c272, %c0_12] : memref<280x128xf32, #tpu.memory_space<vmem>>, vector<1x128xf32>
    %19 = vector.broadcast %18 : vector<1x128xf32> to vector<16x128xf32>
    %20 = arith.addf %17, %19 : vector<16x128xf32>
    %c0_13 = arith.constant 0 : index
    %c0_14 = arith.constant 0 : index
    %21 = vector.load %arg4[%c0_13, %c0_14] : memref<16x128xf32, #tpu.memory_space<vmem>>, vector<16x128xf32>
    tpu.vector_store %arg4[%c0_13, %c0_14], %20 {strides = array<i32>} : memref<16x128xf32, #tpu.memory_space<vmem>>, vector<16x128xf32>,
    return
  }
  func.func @transform_0(%arg0: i32) -> (i32, i32) {
    %c0_i32 = arith.constant 0 : i32
    %c0_i32_0 = arith.constant 0 : i32
    %c0_i32_1 = arith.constant 0 : i32
    return %c0_i32, %c0_i32_0 : i32, i32
  }
  func.func @transform_1(%arg0: i32) -> (i32, i32) {
    %c0_i32 = arith.constant 0 : i32
    %c0_i32_0 = arith.constant 0 : i32
    %c0_i32_1 = arith.constant 0 : i32
    return %c0_i32, %c0_i32_0 : i32, i32
  }
  func.func @transform_2(%arg0: i32) -> (i32, i32) {
    %c0_i32 = arith.constant 0 : i32
    %c0_i32_0 = arith.constant 0 : i32
    %c0_i32_1 = arith.constant 0 : i32
    return %c0_i32, %c0_i32_0 : i32, i32
  }
  func.func @transform_3(%arg0: i32) -> (i32, i32) {
    %c0_i32 = arith.constant 0 : i32
    %c0_i32_0 = arith.constant 0 : i32
    %c0_i32_1 = arith.constant 0 : i32
    return %c0_i32, %c0_i32_0 : i32, i32
  }
}

</mosaic_0001>

<bundles_post_ra>
// kernel: tpu_custom_call.1
= control target key start
LH: loop header
LB: loop body
LE: loop exit
PB: predicated region body
PF: predicated region fallthrough
CT: control target
= control target key end

     0   :  { %8 = vsyncpa [#allocation3], 0  ;;  %s7017_s0 = inlined_call_operand.hbm [shape: f32[16,7056], index: 0, kind: input, shape index: {}]   ;;  %s7018_s1 = inlined_call_operand.hbm [shape: bf16[7056,128], index: 1, kind: input, shape index: {}]   ;;  %s7019_s2 = inlined_call_operand.hbm [shape: f32[280,128], index: 2, kind: input, shape index: {}]   ;;  %s7020_s3 = inlined_call_operand.hbm [shape: f32[16,128], index: 3, kind: output, shape index: {}]  }
   0x1   :  { %9 = vsyncpa [#allocation6], 0 }
   0x2   :  { %10 = vsyncpa [#allocation4], 0  ;;  %s6881_s12 = smov [#allocation5]   ;;  %s6787_s16 = scalar_lea.hbm %s7018_s1, 56448 }
   0x3   :  { %s28_s13 = sshll.u32 %s6881_s12, 4  ;;  %p6788_p0 = scmp.ne.s32.totalorder %s7018_s1, %s6787_s16  ;;  %s29_s13 = int_to_ptr.vmem [resolvable:$true] %s28_s13 }
   0x4   :  { %p6791_p1 = scmp.lt.u32.totalorder %s6787_s16, %s7018_s1 }
   0x6   :  { %p6793_p2 = pnand %p6791_p1, %p6788_p0 }
   0x8   :  { %6796 = shalt.err (!%p6793_p2)
}
   0x9   :  { %s6797_s21 = scalar_lea.vmem %s29_s13, 56448  ;;  %p6802_p4 = scmp.lt.s32.totalorder %s29_s13, %s29_s13 }
   0xa   :  { %p6798_p3 = scmp.ne.s32.totalorder %s29_s13, %s6797_s21  ;;  %p6803_p5 = scmp.lt.s32.totalorder %s6797_s21, %s6797_s21 }
   0xc   :  { %p6804_p6 = por %p6803_p5, %p6802_p4 }
   0xe   :  { %p6805_p7 = pnand %p6804_p6, %p6798_p3 }
  0x10   :  { %6808 = shalt.err (!%p6805_p7)
}
  0x11   :  { %s6882_s22 = smov 64   ;;  %s6883_s23 = smov 4  }
  0x12   :  { %34 = dma.hbm_to_vmem [thread:$0]  %s7018_s1, 56448, %s29_s13, [#allocation6], %s6882_s22, %s6882_s22, %s6883_s23  }
  0x13   :  { %s6884_s26 = smov [#allocation2]   ;;  %s6809_s30 = scalar_lea.hbm %s7017_s0, 14336 }
  0x14   :  { %s16_s27 = sshll.u32 %s6884_s26, 4  ;;  %p6810_p8 = scmp.ne.s32.totalorder %s7017_s0, %s6809_s30  ;;  %s17_s27 = int_to_ptr.vmem [resolvable:$true] %s16_s27 }
  0x15   :  { %p6813_p9 = scmp.lt.u32.totalorder %s6809_s30, %s7017_s0 }
  0x17   :  { %p6815_p10 = pnand %p6813_p9, %p6810_p8 }
  0x19   :  { %6818 = shalt.err (!%p6815_p10)
}
  0x1a   :  { %s6819_s8 = scalar_lea.vmem %s17_s27, 14336  ;;  %p6824_p12 = scmp.lt.s32.totalorder %s17_s27, %s17_s27 }
  0x1b   :  { %p6820_p11 = scmp.ne.s32.totalorder %s17_s27, %s6819_s8  ;;  %p6825_p13 = scmp.lt.s32.totalorder %s6819_s8, %s6819_s8 }
  0x1d   :  { %p6826_p0 = por %p6825_p13, %p6824_p12 }
  0x1f   :  { %p6827_p1 = pnand %p6826_p0, %p6820_p11 }
  0x21   :  { %6830 = shalt.err (!%p6827_p1)
}
  0x22   :  { %s6885_s1 = smov 7168   ;;  %s6886_s9 = smov 448  }
  0x23   :  { %22 = dma.hbm_to_vmem [thread:$0]  %s7017_s0, 14336, %s17_s27, [#allocation3], %s6885_s1, %s6885_s1, %s6886_s9  }
  0x24   :  { %s6887_s12 = smov [#allocation7]   ;;  %s6831_s16 = scalar_lea.hbm %s7019_s2, 4480 }
  0x25   :  { %s40_s13 = sshll.u32 %s6887_s12, 4  ;;  %p6832_p2 = scmp.ne.s32.totalorder %s7019_s2, %s6831_s16  ;;  %s41_s13 = int_to_ptr.vmem [resolvable:$true] %s40_s13 }
  0x26   :  { %p6835_p3 = scmp.lt.u32.totalorder %s6831_s16, %s7019_s2 }
  0x28   :  { %p6837_p4 = pnand %p6835_p3, %p6832_p2 }
  0x2a   :  { %6840 = shalt.err (!%p6837_p4)
}
  0x2b   :  { %s6841_s21 = scalar_lea.vmem %s41_s13, 4480  ;;  %p6846_p6 = scmp.lt.s32.totalorder %s41_s13, %s41_s13 }
  0x2c   :  { %p6842_p5 = scmp.ne.s32.totalorder %s41_s13, %s6841_s21  ;;  %p6847_p7 = scmp.lt.s32.totalorder %s6841_s21, %s6841_s21 }
  0x2e   :  { %p6848_p8 = por %p6847_p7, %p6846_p6 }
  0x30   :  { %p6849_p9 = pnand %p6848_p8, %p6842_p5 }
  0x32   :  { %6852 = shalt.err (!%p6849_p9)
}
  0x33   :  { %s6888_s0 = smov 128   ;;  %s6889_s22 = smov 8  }
  0x34   :  { %46 = dma.hbm_to_vmem [thread:$0]  %s7019_s2, 4480, %s41_s13, [#allocation6], %s6888_s0, %s6888_s0, %s6889_s22  }
  0x35   :  { %6875 = dma.done.wait [#allocation3], 14336  }
  0x36   :  { %6876 = vsyncadd [#allocation3], 4294952960 }
  0x37   :  { %6877 = dma.done.wait [#allocation6], 60928  }
  0x38   :  { %6878 = vsyncadd [#allocation6], 4294906368  ;;  %v6346_v0 = vld [vmem:[#allocation5 + $0x40] sm:$0xff]   ;;  %v6350_v4 = vld [vmem:[#allocation5 + $0x48] sm:$0xff]   ;;  %vm3758_vm0 = vcmask 130048   ;;  %s6891_s2 = smov [#allocation8]  }
  0x39   :  { %v6347_v1 = vld [vmem:[#allocation5 + $0xc0] sm:$0xff]   ;;  %5571 = vmatprep.subr.bf16.mxu0 %v6346_v0  ;;  %v6351_v5 = vld [vmem:[#allocation5 + $0xc8] sm:$0xff]   ;;  %v6354_v8 = vld [vmem:[#allocation5 + $0x50] sm:$0xff]   ;;  %s5113_s25 = sshll.u32 %s6891_s2, 4  ;;  %s5114_s25 = int_to_ptr.vmem [resolvable:$true] %s5113_s25 }
  0x3a   :  { %v6348_v2 = vld [vmem:[#allocation5] sm:$0xff]   ;;  %5593 = vmatprep.subr.bf16.mxu1 %v6347_v1  ;;  %v6352_v6 = vld [vmem:[#allocation5 + $0x8] sm:$0xff]   ;;  %v6355_v9 = vld [vmem:[#allocation5 + $0xd0] sm:$0xff]   ;;  %s6853_s26 = scalar_lea.vmem %s5114_s25, 256  ;;  %p6858_p11 = scmp.lt.s32.totalorder %s5114_s25, %s5114_s25 }
  0x3b   :  { %v6349_v3 = vld [vmem:[#allocation5 + $0x80] sm:$0xff]   ;;  %5572 = vmatpush3.bf16.msra.mxu0 %v6348_v2  ;;  %v6353_v7 = vld [vmem:[#allocation5 + $0x88] sm:$0xff]   ;;  %v6356_v10 = vld [vmem:[#allocation5 + $0x10] sm:$0xff]   ;;  %p6854_p10 = scmp.ne.s32.totalorder %s5114_s25, %s6853_s26  ;;  %p6859_p12 = scmp.lt.s32.totalorder %s6853_s26, %s6853_s26 }
  0x3c   :  { %5594 = vmatpush3.bf16.msra.mxu1 %v6349_v3  ;;  %5573 = vmatprep.subr.bf16.mxu0 %v6350_v4  ;;  %v6357_v11 = vld [vmem:[#allocation5 + $0x90] sm:$0xff]   ;;  %v6358_v12 = vld [vmem:[#allocation5 + $0x58] sm:$0xff]   ;;  %v6362_v16 = vld [vmem:[#allocation5 + $0x60] sm:$0xff]  }
  0x3d   :  { %5595 = vmatprep.subr.bf16.mxu1 %v6351_v5  ;;  %v6359_v13 = vld [vmem:[#allocation5 + $0xd8] sm:$0xff]   ;;  %v6363_v17 = vld [vmem:[#allocation5 + $0xe0] sm:$0xff]   ;;  %v6366_v20 = vld [vmem:[#allocation5 + $0x68] sm:$0xff]   ;;  %p6860_p13 = por %p6859_p12, %p6858_p11 }
  0x3e   :  { %v6360_v14 = vld [vmem:[#allocation5 + $0x18] sm:$0xff]   ;;  %v6364_v18 = vld [vmem:[#allocation5 + $0x20] sm:$0xff]   ;;  %v6367_v21 = vld [vmem:[#allocation5 + $0xe8] sm:$0xff]  }
  0x3f   :  { %5574 = vmatpush3.bf16.msra.mxu0 %v6352_v6  ;;  %v6361_v15 = vld [vmem:[#allocation5 + $0x98] sm:$0xff]   ;;  %v6365_v19 = vld [vmem:[#allocation5 + $0xa0] sm:$0xff]   ;;  %v6368_v22 = vld [vmem:[#allocation5 + $0x28] sm:$0xff]   ;;  %p6861_p0 = pnand %p6860_p13, %p6854_p10 }
  0x40   :  { %5596 = vmatpush3.bf16.msra.mxu1 %v6353_v7  ;;  %5575 = vmatprep.subr.bf16.mxu0 %v6354_v8  ;;  %v6369_v23 = vld [vmem:[#allocation5 + $0xa8] sm:$0xff]   ;;  %v6370_v24 = vld [vmem:[#allocation5 + $0x70] sm:$0xff]   ;;  %v6374_v28 = vld [vmem:[#allocation5 + $0x78] sm:$0xff]  }
  0x41   :  { %5597 = vmatprep.subr.bf16.mxu1 %v6355_v9  ;;  %v6371_v25 = vld [vmem:[#allocation5 + $0xf0] sm:$0xff]   ;;  %v6375_v29 = vld [vmem:[#allocation5 + $0xf8] sm:$0xff]   ;;  %v58_v32 = vld [vmem:[#allocation2 + $0x8] sm:$0xff] }
  0x42   :  { %v6372_v26 = vld [vmem:[#allocation5 + $0x30] sm:$0xff]   ;;  %v6376_v30 = vld [vmem:[#allocation5 + $0x38] sm:$0xff]   ;;  %v114_v33 = vld [vmem:[#allocation2 + $0x1c8] sm:$0xff] }
  0x43   :  { %5576 = vmatpush3.bf16.msra.mxu0 %v6356_v10  ;;  %v6373_v27 = vld [vmem:[#allocation5 + $0xb0] sm:$0xff]   ;;  %v6377_v31 = vld [vmem:[#allocation5 + $0xb8] sm:$0xff]   ;;  %v170_v35 = vpack.c.bf16 %v114_v33, %v58_v32  ;;  %v57_v37 = vld [vmem:[#allocation2] sm:$0xff] }
  0x44   :  { %5598 = vmatpush3.bf16.msra.mxu1 %v6357_v11  ;;  %5577 = vmatprep.subr.bf16.mxu0 %v6358_v12  ;;  %v60_v34 = vld [vmem:[#allocation2 + $0x18] sm:$0xff]  ;;  %v113_v38 = vld [vmem:[#allocation2 + $0x1c0] sm:$0xff]  ;;  %v59_v41 = vld [vmem:[#allocation2 + $0x10] sm:$0xff] }
  0x45   :  { %5599 = vmatprep.subr.bf16.mxu1 %v6359_v13  ;;  %v116_v36 = vld [vmem:[#allocation2 + $0x1d8] sm:$0xff]  ;;  %v169_v40 = vpack.c.bf16 %v113_v38, %v57_v37  ;;  %v115_v42 = vld [vmem:[#allocation2 + $0x1d0] sm:$0xff]  ;;  %3794 = vmatprep.mubr.bf16.mxu0 %v170_v35  ;;  %v6378_v44 = vld [vmem:[#allocation5 + $0x140] sm:$0xff]  }
  0x46   :  { %v172_v39 = vpack.c.bf16 %v116_v36, %v60_v34  ;;  %v171_v43 = vpack.c.bf16 %v115_v42, %v59_v41  ;;  %v6379_v45 = vld [vmem:[#allocation5 + $0x1c0] sm:$0xff]   ;;  %v6382_v48 = vld [vmem:[#allocation5 + $0x148] sm:$0xff]   ;;  %v6386_v52 = vld [vmem:[#allocation5 + $0x150] sm:$0xff]  }
  0x47   :  { %5578 = vmatpush3.bf16.msra.mxu0 %v6360_v14  ;;  %v6380_v46 = vld [vmem:[#allocation5 + $0x100] sm:$0xff]   ;;  %v6383_v49 = vld [vmem:[#allocation5 + $0x1c8] sm:$0xff]   ;;  %v6387_v53 = vld [vmem:[#allocation5 + $0x1d0] sm:$0xff]  }
  0x48   :  { %5600 = vmatpush3.bf16.msra.mxu1 %v6361_v15  ;;  %5579 = vmatprep.subr.bf16.mxu0 %v6362_v16  ;;  %v6381_v47 = vld [vmem:[#allocation5 + $0x180] sm:$0xff]   ;;  %v6384_v50 = vld [vmem:[#allocation5 + $0x108] sm:$0xff]   ;;  %v6388_v54 = vld [vmem:[#allocation5 + $0x110] sm:$0xff]  }
  0x49   :  { %5601 = vmatprep.subr.bf16.mxu1 %v6363_v17  ;;  %3835 = vmatprep.mubr.bf16.mxu1 %v172_v39  ;;  %v6385_v51 = vld [vmem:[#allocation5 + $0x188] sm:$0xff]   ;;  %v6389_v55 = vld [vmem:[#allocation5 + $0x190] sm:$0xff]   ;;  %v6390_v56 = vld [vmem:[#allocation5 + $0x158] sm:$0xff]  }
  0x4a   :  { %v6391_v57 = vld [vmem:[#allocation5 + $0x1d8] sm:$0xff]   ;;  %v6394_v60 = vld [vmem:[#allocation5 + $0x160] sm:$0xff]   ;;  %v6398_v0 = vld [vmem:[#allocation5 + $0x168] sm:$0xff]  }
  0x4b   :  { %5580 = vmatpush3.bf16.msra.mxu0 %v6364_v18  ;;  %v6392_v58 = vld [vmem:[#allocation5 + $0x118] sm:$0xff]   ;;  %v6395_v61 = vld [vmem:[#allocation5 + $0x1e0] sm:$0xff]   ;;  %v6399_v1 = vld [vmem:[#allocation5 + $0x1e8] sm:$0xff]  }
  0x4c   :  { %5602 = vmatpush3.bf16.msra.mxu1 %v6365_v19  ;;  %5581 = vmatprep.subr.bf16.mxu0 %v6366_v20  ;;  %v6393_v59 = vld [vmem:[#allocation5 + $0x198] sm:$0xff]   ;;  %v6396_v62 = vld [vmem:[#allocation5 + $0x120] sm:$0xff]   ;;  %v6400_v2 = vld [vmem:[#allocation5 + $0x128] sm:$0xff]  }
  0x4d   :  { %5603 = vmatprep.subr.bf16.mxu1 %v6367_v21  ;;  %v6397_v63 = vld [vmem:[#allocation5 + $0x1a0] sm:$0xff]   ;;  %v6401_v3 = vld [vmem:[#allocation5 + $0x1a8] sm:$0xff]   ;;  %v6402_v4 = vld [vmem:[#allocation5 + $0x170] sm:$0xff]  }
  0x4e   :  { %v6403_v5 = vld [vmem:[#allocation5 + $0x1f0] sm:$0xff]   ;;  %v6406_v8 = vld [vmem:[#allocation5 + $0x178] sm:$0xff]   ;;  %v62_v12 = vld [vmem:[#allocation2 + $0x28] sm:$0xff] }
  0x4f   :  { %5582 = vmatpush3.bf16.msra.mxu0 %v6368_v22  ;;  %v6404_v6 = vld [vmem:[#allocation5 + $0x130] sm:$0xff]   ;;  %v6407_v9 = vld [vmem:[#allocation5 + $0x1f8] sm:$0xff]   ;;  %v118_v13 = vld [vmem:[#allocation2 + $0x1e8] sm:$0xff] }
  0x50   :  { %5604 = vmatpush3.bf16.msra.mxu1 %v6369_v23  ;;  %5583 = vmatprep.subr.bf16.mxu0 %v6370_v24  ;;  %v6405_v7 = vld [vmem:[#allocation5 + $0x1b0] sm:$0xff]   ;;  %v6408_v10 = vld [vmem:[#allocation5 + $0x138] sm:$0xff]   ;;  %v174_v16 = vpack.c.bf16 %v118_v13, %v62_v12  ;;  %v61_v18 = vld [vmem:[#allocation2 + $0x20] sm:$0xff] }
  0x51   :  { %5605 = vmatprep.subr.bf16.mxu1 %v6371_v25  ;;  %v6409_v11 = vld [vmem:[#allocation5 + $0x1b8] sm:$0xff]   ;;  %v117_v19 = vld [vmem:[#allocation2 + $0x1e0] sm:$0xff]  ;;  %v63_v20 = vld [vmem:[#allocation2 + $0x30] sm:$0xff] }
  0x52   :  { %v64_v14 = vld [vmem:[#allocation2 + $0x38] sm:$0xff]  ;;  %v173_v21 = vpack.c.bf16 %v117_v19, %v61_v18  ;;  %v119_v22 = vld [vmem:[#allocation2 + $0x1f0] sm:$0xff]  ;;  %v6410_v24 = vld [vmem:[#allocation5 + $0x240] sm:$0xff]  }
  0x53   :  { %5584 = vmatpush3.bf16.msra.mxu0 %v6372_v26  ;;  %v120_v15 = vld [vmem:[#allocation2 + $0x1f8] sm:$0xff]  ;;  %v175_v23 = vpack.c.bf16 %v119_v22, %v63_v20  ;;  %v6411_v25 = vld [vmem:[#allocation5 + $0x2c0] sm:$0xff]   ;;  %v6418_v32 = vld [vmem:[#allocation5 + $0x250] sm:$0xff]  }
  0x54   :  { %5606 = vmatpush3.bf16.msra.mxu1 %v6373_v27  ;;  %5585 = vmatprep.subr.bf16.mxu0 %v6374_v28  ;;  %v176_v17 = vpack.c.bf16 %v120_v15, %v64_v14  ;;  %v6412_v26 = vld [vmem:[#allocation5 + $0x200] sm:$0xff]   ;;  %v6414_v28 = vld [vmem:[#allocation5 + $0x248] sm:$0xff]   ;;  %v6419_v33 = vld [vmem:[#allocation5 + $0x2d0] sm:$0xff]  }
  0x55   :  { %5607 = vmatprep.subr.bf16.mxu1 %v6375_v29  ;;  %v6413_v27 = vld [vmem:[#allocation5 + $0x280] sm:$0xff]   ;;  %v6415_v29 = vld [vmem:[#allocation5 + $0x2c8] sm:$0xff]   ;;  %v6420_v34 = vld [vmem:[#allocation5 + $0x210] sm:$0xff]  }
  0x56   :  { %v6421_v35 = vld [vmem:[#allocation5 + $0x290] sm:$0xff]   ;;  %v6422_v36 = vld [vmem:[#allocation5 + $0x258] sm:$0xff]   ;;  %v6427_v41 = vld [vmem:[#allocation5 + $0x2e0] sm:$0xff]  }
  0x57   :  { %5586 = vmatpush3.bf16.msra.mxu0 %v6376_v30  ;;  %v6416_v30 = vld [vmem:[#allocation5 + $0x208] sm:$0xff]   ;;  %v6423_v37 = vld [vmem:[#allocation5 + $0x2d8] sm:$0xff]   ;;  %v6428_v42 = vld [vmem:[#allocation5 + $0x220] sm:$0xff]  }
  0x58   :  { %5608 = vmatpush3.bf16.msra.mxu1 %v6377_v31  ;;  %5615 = vmatprep.subr.bf16.mxu0 %v6378_v44  ;;  %v6417_v31 = vld [vmem:[#allocation5 + $0x288] sm:$0xff]   ;;  %v6424_v38 = vld [vmem:[#allocation5 + $0x218] sm:$0xff]   ;;  %v6450_v12 = vld [vmem:[#allocation5 + $0x350] sm:$0xff]  }
  0x59   :  { %5637 = vmatprep.subr.bf16.mxu1 %v6379_v45  ;;  %v6425_v39 = vld [vmem:[#allocation5 + $0x298] sm:$0xff]   ;;  %v6430_v44 = vld [vmem:[#allocation5 + $0x268] sm:$0xff]   ;;  %v6451_v13 = vld [vmem:[#allocation5 + $0x3d0] sm:$0xff]  }
  0x5a   :  { %3795 = vmatmul.mubr.bf16.vlgmr.msra.gmra.mrb[0].mxu0 %v169_v40  ;;  %v6426_v40 = vld [vmem:[#allocation5 + $0x260] sm:$0xff]   ;;  %v6431_v45 = vld [vmem:[#allocation5 + $0x2e8] sm:$0xff]   ;;  %v6452_v14 = vld [vmem:[#allocation5 + $0x310] sm:$0xff]  }
  0x5b   :  { %3836 = vmatmul.mubr.bf16.vlgmr.msra.gmra.mrb[0].mxu1 %v171_v43  ;;  %5616 = vmatpush3.bf16.msra.mxu0 %v6380_v46  ;;  %v6429_v43 = vld [vmem:[#allocation5 + $0x2a0] sm:$0xff]   ;;  %v6432_v46 = vld [vmem:[#allocation5 + $0x228] sm:$0xff]   ;;  %v6453_v15 = vld [vmem:[#allocation5 + $0x390] sm:$0xff]  }
  0x5c   :  { %5638 = vmatpush3.bf16.msra.mxu1 %v6381_v47  ;;  %5617 = vmatprep.subr.bf16.mxu0 %v6382_v48  ;;  %v6433_v47 = vld [vmem:[#allocation5 + $0x2a8] sm:$0xff]   ;;  %v6434_v48 = vld [vmem:[#allocation5 + $0x270] sm:$0xff]   ;;  %v6456_v18 = vld [vmem:[#allocation5 + $0x318] sm:$0xff]  }
  0x5d   :  { %5639 = vmatprep.subr.bf16.mxu1 %v6383_v49  ;;  %3876 = vmatprep.mubr.bf16.mxu0 %v174_v16  ;;  %v6435_v49 = vld [vmem:[#allocation5 + $0x2f0] sm:$0xff]   ;;  %v6454_v16 = vld [vmem:[#allocation5 + $0x358] sm:$0xff]   ;;  %v6458_v20 = vld [vmem:[#allocation5 + $0x360] sm:$0xff]  }
  0x5e   :  { %3917 = vmatprep.mubr.bf16.mxu1 %v176_v17  ;;  %v6455_v17 = vld [vmem:[#allocation5 + $0x3d8] sm:$0xff]   ;;  %v6460_v22 = vld [vmem:[#allocation5 + $0x320] sm:$0xff]  }
  0x5f   :  { %5618 = vmatpush3.bf16.msra.mxu0 %v6384_v50  ;;  %v6436_v50 = vld [vmem:[#allocation5 + $0x230] sm:$0xff]   ;;  %v6457_v19 = vld [vmem:[#allocation5 + $0x398] sm:$0xff]  }
  0x60   :  { %5640 = vmatpush3.bf16.msra.mxu1 %v6385_v51  ;;  %5619 = vmatprep.subr.bf16.mxu0 %v6386_v52  ;;  %v6437_v51 = vld [vmem:[#allocation5 + $0x2b0] sm:$0xff]   ;;  %v6438_v52 = vld [vmem:[#allocation5 + $0x278] sm:$0xff]  }
  0x61   :  { %5641 = vmatprep.subr.bf16.mxu1 %v6387_v53  ;;  %v6439_v53 = vld [vmem:[#allocation5 + $0x2f8] sm:$0xff]  }
  0x63   :  { %5620 = vmatpush3.bf16.msra.mxu0 %v6388_v54  ;;  %v6440_v54 = vld [vmem:[#allocation5 + $0x238] sm:$0xff]  }
  0x64   :  { %5642 = vmatpush3.bf16.msra.mxu1 %v6389_v55  ;;  %5621 = vmatprep.subr.bf16.mxu0 %v6390_v56  ;;  %v6441_v55 = vld [vmem:[#allocation5 + $0x2b8] sm:$0xff]   ;;  %v66_v56 = vld [vmem:[#allocation2 + $0x48] sm:$0xff] }
  0x65   :  { %5643 = vmatprep.subr.bf16.mxu1 %v6391_v57  ;;  %v122_v57 = vld [vmem:[#allocation2 + $0x208] sm:$0xff] }
  0x67   :  { %5622 = vmatpush3.bf16.msra.mxu0 %v6392_v58  ;;  %v178_v58 = vpack.c.bf16 %v122_v57, %v66_v56  ;;  %v6482_v56 = vld [vmem:[#allocation5 + $0x450] sm:$0xff]  }
  0x68   :  { %5644 = vmatpush3.bf16.msra.mxu1 %v6393_v59  ;;  %5623 = vmatprep.subr.bf16.mxu0 %v6394_v60  ;;  %v68_v59 = vld [vmem:[#allocation2 + $0x58] sm:$0xff]  ;;  %v6483_v57 = vld [vmem:[#allocation5 + $0x4d0] sm:$0xff]  }
  0x69   :  { %5645 = vmatprep.subr.bf16.mxu1 %v6395_v61  ;;  %v124_v60 = vld [vmem:[#allocation2 + $0x218] sm:$0xff]  ;;  %v65_v61 = vld [vmem:[#allocation2 + $0x40] sm:$0xff] }
  0x6b   :  { %5624 = vmatpush3.bf16.msra.mxu0 %v6396_v62  ;;  %v180_v62 = vpack.c.bf16 %v124_v60, %v68_v59  ;;  %v6485_v59 = vld [vmem:[#allocation5 + $0x490] sm:$0xff]   ;;  %v6486_v60 = vld [vmem:[#allocation5 + $0x458] sm:$0xff]  }
  0x6c   :  { %5646 = vmatpush3.bf16.msra.mxu1 %v6397_v63  ;;  %5625 = vmatprep.subr.bf16.mxu0 %v6398_v0  ;;  %v121_v63 = vld [vmem:[#allocation2 + $0x200] sm:$0xff]  ;;  %v67_v0 = vld [vmem:[#allocation2 + $0x50] sm:$0xff] }
  0x6d   :  { %5647 = vmatprep.subr.bf16.mxu1 %v6399_v1  ;;  %v123_v1 = vld [vmem:[#allocation2 + $0x210] sm:$0xff] }
  0x6f   :  { %5626 = vmatpush3.bf16.msra.mxu0 %v6400_v2  ;;  %v177_v2 = vpack.c.bf16 %v121_v63, %v65_v61  ;;  %v6487_v61 = vld [vmem:[#allocation5 + $0x4d8] sm:$0xff]  }
  0x70   :  { %5648 = vmatpush3.bf16.msra.mxu1 %v6401_v3  ;;  %5627 = vmatprep.subr.bf16.mxu0 %v6402_v4  ;;  %v179_v3 = vpack.c.bf16 %v123_v1, %v67_v0  ;;  %v6442_v4 = vld [vmem:[#allocation5 + $0x340] sm:$0xff]   ;;  %v6489_v63 = vld [vmem:[#allocation5 + $0x498] sm:$0xff]  }
  0x71   :  { %5649 = vmatprep.subr.bf16.mxu1 %v6403_v5  ;;  %v6443_v5 = vld [vmem:[#allocation5 + $0x3c0] sm:$0xff]  }
  0x72   :  { %v6490_v0 = vld [vmem:[#allocation5 + $0x460] sm:$0xff]  }
  0x73   :  { %5628 = vmatpush3.bf16.msra.mxu0 %v6404_v6  ;;  %v6444_v6 = vld [vmem:[#allocation5 + $0x300] sm:$0xff]  }
  0x74   :  { %5650 = vmatpush3.bf16.msra.mxu1 %v6405_v7  ;;  %5629 = vmatprep.subr.bf16.mxu0 %v6406_v8  ;;  %v6445_v7 = vld [vmem:[#allocation5 + $0x380] sm:$0xff]   ;;  %v6446_v8 = vld [vmem:[#allocation5 + $0x348] sm:$0xff]  }
  0x75   :  { %5651 = vmatprep.subr.bf16.mxu1 %v6407_v9  ;;  %v6447_v9 = vld [vmem:[#allocation5 + $0x3c8] sm:$0xff]   ;;  %v6491_v1 = vld [vmem:[#allocation5 + $0x4e0] sm:$0xff]  }
  0x77   :  { %5630 = vmatpush3.bf16.msra.mxu0 %v6408_v10  ;;  %v6448_v10 = vld [vmem:[#allocation5 + $0x308] sm:$0xff]  }
  0x78   :  { %5652 = vmatpush3.bf16.msra.mxu1 %v6409_v11  ;;  %5659 = vmatprep.subr.bf16.mxu0 %v6410_v24  ;;  %v6449_v11 = vld [vmem:[#allocation5 + $0x388] sm:$0xff]  }
  0x79   :  { %5681 = vmatprep.subr.bf16.mxu1 %v6411_v25  ;;  %v6462_v24 = vld [vmem:[#allocation5 + $0x368] sm:$0xff]  }
  0x7a   :  { %3877 = vmatmul.mubr.bf16.vlgmr.msra.gmra.mrb[4].mxu0 %v173_v21  ;;  %v6459_v21 = vld [vmem:[#allocation5 + $0x3e0] sm:$0xff]   ;;  %v6463_v25 = vld [vmem:[#allocation5 + $0x3e8] sm:$0xff]  }
  0x7b   :  { %3918 = vmatmul.mubr.bf16.vlgmr.msra.gmra.mrb[4].mxu1 %v175_v23  ;;  %5660 = vmatpush3.bf16.msra.mxu0 %v6412_v26  ;;  %v6461_v23 = vld [vmem:[#allocation5 + $0x3a0] sm:$0xff]   ;;  %v6464_v26 = vld [vmem:[#allocation5 + $0x328] sm:$0xff]  }
  0x7c   :  { %5682 = vmatpush3.bf16.msra.mxu1 %v6413_v27  ;;  %5661 = vmatprep.subr.bf16.mxu0 %v6414_v28  ;;  %v6465_v27 = vld [vmem:[#allocation5 + $0x3a8] sm:$0xff]   ;;  %v6466_v28 = vld [vmem:[#allocation5 + $0x370] sm:$0xff]  }
  0x7d   :  { %5683 = vmatprep.subr.bf16.mxu1 %v6415_v29  ;;  %3958 = vmatprep.mubr.bf16.mxu0 %v178_v58  ;;  %v6467_v29 = vld [vmem:[#allocation5 + $0x3f0] sm:$0xff]  }
  0x7e   :  { %3999 = vmatprep.mubr.bf16.mxu1 %v180_v62  ;;  %v6484_v58 = vld [vmem:[#allocation5 + $0x410] sm:$0xff]   ;;  %v6488_v62 = vld [vmem:[#allocation5 + $0x418] sm:$0xff]  }
  0x7f   :  { %5662 = vmatpush3.bf16.msra.mxu0 %v6416_v30  ;;  %v6468_v30 = vld [vmem:[#allocation5 + $0x330] sm:$0xff]  }
  0x80   :  { %5684 = vmatpush3.bf16.msra.mxu1 %v6417_v31  ;;  %5663 = vmatprep.subr.bf16.mxu0 %v6418_v32  ;;  %v6469_v31 = vld [vmem:[#allocation5 + $0x3b0] sm:$0xff]   ;;  %v6470_v32 = vld [vmem:[#allocation5 + $0x378] sm:$0xff]  }
  0x81   :  { %5685 = vmatprep.subr.bf16.mxu1 %v6419_v33  ;;  %v6471_v33 = vld [vmem:[#allocation5 + $0x3f8] sm:$0xff]  }
  0x83   :  { %5664 = vmatpush3.bf16.msra.mxu0 %v6420_v34  ;;  %v6472_v34 = vld [vmem:[#allocation5 + $0x338] sm:$0xff]  }
  0x84   :  { %5686 = vmatpush3.bf16.msra.mxu1 %v6421_v35  ;;  %5665 = vmatprep.subr.bf16.mxu0 %v6422_v36  ;;  %v6473_v35 = vld [vmem:[#allocation5 + $0x3b8] sm:$0xff]   ;;  %v70_v36 = vld [vmem:[#allocation2 + $0x68] sm:$0xff] }
  0x85   :  { %5687 = vmatprep.subr.bf16.mxu1 %v6423_v37  ;;  %v126_v37 = vld [vmem:[#allocation2 + $0x228] sm:$0xff] }
  0x87   :  { %5666 = vmatpush3.bf16.msra.mxu0 %v6424_v38  ;;  %v72_v38 = vld [vmem:[#allocation2 + $0x78] sm:$0xff] }
  0x88   :  { %5688 = vmatpush3.bf16.msra.mxu1 %v6425_v39  ;;  %5667 = vmatprep.subr.bf16.mxu0 %v6426_v40  ;;  %v182_v39 = vpack.c.bf16 %v126_v37, %v70_v36  ;;  %v128_v40 = vld [vmem:[#allocation2 + $0x238] sm:$0xff]  ;;  %v6514_v36 = vld [vmem:[#allocation5 + $0x550] sm:$0xff]  }
  0x89   :  { %5689 = vmatprep.subr.bf16.mxu1 %v6427_v41  ;;  %v69_v41 = vld [vmem:[#allocation2 + $0x60] sm:$0xff]  ;;  %v6515_v37 = vld [vmem:[#allocation5 + $0x5d0] sm:$0xff]  }
  0x8b   :  { %5668 = vmatpush3.bf16.msra.mxu0 %v6428_v42  ;;  %v125_v42 = vld [vmem:[#allocation2 + $0x220] sm:$0xff] }
  0x8c   :  { %5690 = vmatpush3.bf16.msra.mxu1 %v6429_v43  ;;  %5669 = vmatprep.subr.bf16.mxu0 %v6430_v44  ;;  %v184_v43 = vpack.c.bf16 %v128_v40, %v72_v38  ;;  %v181_v44 = vpack.c.bf16 %v125_v42, %v69_v41  ;;  %v6516_v38 = vld [vmem:[#allocation5 + $0x510] sm:$0xff]   ;;  %v6518_v40 = vld [vmem:[#allocation5 + $0x558] sm:$0xff]  }
  0x8d   :  { %5691 = vmatprep.subr.bf16.mxu1 %v6431_v45  ;;  %v71_v45 = vld [vmem:[#allocation2 + $0x70] sm:$0xff]  ;;  %v6519_v41 = vld [vmem:[#allocation5 + $0x5d8] sm:$0xff]  }
  0x8e   :  { %v6520_v42 = vld [vmem:[#allocation5 + $0x518] sm:$0xff]  }
  0x8f   :  { %5670 = vmatpush3.bf16.msra.mxu0 %v6432_v46  ;;  %v127_v46 = vld [vmem:[#allocation2 + $0x230] sm:$0xff] }
  0x90   :  { %5692 = vmatpush3.bf16.msra.mxu1 %v6433_v47  ;;  %5671 = vmatprep.subr.bf16.mxu0 %v6434_v48  ;;  %v183_v47 = vpack.c.bf16 %v127_v46, %v71_v45  ;;  %v6474_v48 = vld [vmem:[#allocation5 + $0x440] sm:$0xff]  }
  0x91   :  { %5693 = vmatprep.subr.bf16.mxu1 %v6435_v49  ;;  %v6475_v49 = vld [vmem:[#allocation5 + $0x4c0] sm:$0xff]  }
  0x92   :  { %v6523_v45 = vld [vmem:[#allocation5 + $0x5e0] sm:$0xff]  }
  0x93   :  { %5672 = vmatpush3.bf16.msra.mxu0 %v6436_v50  ;;  %v6476_v50 = vld [vmem:[#allocation5 + $0x400] sm:$0xff]  }
  0x94   :  { %5694 = vmatpush3.bf16.msra.mxu1 %v6437_v51  ;;  %5673 = vmatprep.subr.bf16.mxu0 %v6438_v52  ;;  %v6477_v51 = vld [vmem:[#allocation5 + $0x480] sm:$0xff]   ;;  %v6478_v52 = vld [vmem:[#allocation5 + $0x448] sm:$0xff]  }
  0x95   :  { %5695 = vmatprep.subr.bf16.mxu1 %v6439_v53  ;;  %v6479_v53 = vld [vmem:[#allocation5 + $0x4c8] sm:$0xff]   ;;  %v6524_v46 = vld [vmem:[#allocation5 + $0x520] sm:$0xff]  }
  0x97   :  { %5674 = vmatpush3.bf16.msra.mxu0 %v6440_v54  ;;  %v6480_v54 = vld [vmem:[#allocation5 + $0x408] sm:$0xff]  }
  0x98   :  { %5696 = vmatpush3.bf16.msra.mxu1 %v6441_v55  ;;  %5703 = vmatprep.subr.bf16.mxu0 %v6442_v4  ;;  %v6481_v55 = vld [vmem:[#allocation5 + $0x488] sm:$0xff]  }
  0x99   :  { %5725 = vmatprep.subr.bf16.mxu1 %v6443_v5  ;;  %v6494_v4 = vld [vmem:[#allocation5 + $0x468] sm:$0xff]  }
  0x9a   :  { %3959 = vmatmul.mubr.bf16.vlgmr.msra.gmra.mrb[8].mxu0 %v177_v2  ;;  %v6492_v2 = vld [vmem:[#allocation5 + $0x420] sm:$0xff]   ;;  %v6495_v5 = vld [vmem:[#allocation5 + $0x4e8] sm:$0xff]  }
  0x9b   :  { %4000 = vmatmul.mubr.bf16.vlgmr.msra.gmra.mrb[8].mxu1 %v179_v3  ;;  %5704 = vmatpush3.bf16.msra.mxu0 %v6444_v6  ;;  %v6493_v3 = vld [vmem:[#allocation5 + $0x4a0] sm:$0xff]   ;;  %v6496_v6 = vld [vmem:[#allocation5 + $0x428] sm:$0xff]  }
  0x9c   :  { %5726 = vmatpush3.bf16.msra.mxu1 %v6445_v7  ;;  %5705 = vmatprep.subr.bf16.mxu0 %v6446_v8  ;;  %v6497_v7 = vld [vmem:[#allocation5 + $0x4a8] sm:$0xff]   ;;  %v6498_v8 = vld [vmem:[#allocation5 + $0x470] sm:$0xff]  }
  0x9d   :  { %5727 = vmatprep.subr.bf16.mxu1 %v6447_v9  ;;  %4040 = vmatprep.mubr.bf16.mxu0 %v182_v39  ;;  %v6499_v9 = vld [vmem:[#allocation5 + $0x4f0] sm:$0xff]  }
  0x9e   :  { %4081 = vmatprep.mubr.bf16.mxu1 %v184_v43  ;;  %v6517_v39 = vld [vmem:[#allocation5 + $0x590] sm:$0xff]   ;;  %v6521_v43 = vld [vmem:[#allocation5 + $0x598] sm:$0xff]  }
  0x9f   :  { %5706 = vmatpush3.bf16.msra.mxu0 %v6448_v10  ;;  %v6500_v10 = vld [vmem:[#allocation5 + $0x430] sm:$0xff]  }
  0xa0   :  { %5728 = vmatpush3.bf16.msra.mxu1 %v6449_v11  ;;  %5707 = vmatprep.subr.bf16.mxu0 %v6450_v12  ;;  %v6501_v11 = vld [vmem:[#allocation5 + $0x4b0] sm:$0xff]   ;;  %v6502_v12 = vld [vmem:[#allocation5 + $0x478] sm:$0xff]  }
  0xa1   :  { %5729 = vmatprep.subr.bf16.mxu1 %v6451_v13  ;;  %v6503_v13 = vld [vmem:[#allocation5 + $0x4f8] sm:$0xff]  }
  0xa3   :  { %5708 = vmatpush3.bf16.msra.mxu0 %v6452_v14  ;;  %v6504_v14 = vld [vmem:[#allocation5 + $0x438] sm:$0xff]  }
  0xa4   :  { %5730 = vmatpush3.bf16.msra.mxu1 %v6453_v15  ;;  %5709 = vmatprep.subr.bf16.mxu0 %v6454_v16  ;;  %v6505_v15 = vld [vmem:[#allocation5 + $0x4b8] sm:$0xff]   ;;  %v74_v16 = vld [vmem:[#allocation2 + $0x88] sm:$0xff] }
  0xa5   :  { %5731 = vmatprep.subr.bf16.mxu1 %v6455_v17  ;;  %v130_v17 = vld [vmem:[#allocation2 + $0x248] sm:$0xff] }
  0xa7   :  { %5710 = vmatpush3.bf16.msra.mxu0 %v6456_v18  ;;  %v76_v18 = vld [vmem:[#allocation2 + $0x98] sm:$0xff] }
  0xa8   :  { %5732 = vmatpush3.bf16.msra.mxu1 %v6457_v19  ;;  %5711 = vmatprep.subr.bf16.mxu0 %v6458_v20  ;;  %v132_v19 = vld [vmem:[#allocation2 + $0x258] sm:$0xff]  ;;  %v186_v20 = vpack.c.bf16 %v130_v17, %v74_v16  ;;  %v6546_v16 = vld [vmem:[#allocation5 + $0x650] sm:$0xff]  }
  0xa9   :  { %5733 = vmatprep.subr.bf16.mxu1 %v6459_v21  ;;  %v188_v21 = vpack.c.bf16 %v132_v19, %v76_v18  ;;  %v6547_v17 = vld [vmem:[#allocation5 + $0x6d0] sm:$0xff]  }
  0xaa   :  { %v6548_v18 = vld [vmem:[#allocation5 + $0x610] sm:$0xff]  }
  0xab   :  { %5712 = vmatpush3.bf16.msra.mxu0 %v6460_v22  ;;  %v73_v22 = vld [vmem:[#allocation2 + $0x80] sm:$0xff]  ;;  %v6549_v19 = vld [vmem:[#allocation5 + $0x690] sm:$0xff]  }
  0xac   :  { %5734 = vmatpush3.bf16.msra.mxu1 %v6461_v23  ;;  %5713 = vmatprep.subr.bf16.mxu0 %v6462_v24  ;;  %v129_v23 = vld [vmem:[#allocation2 + $0x240] sm:$0xff]  ;;  %v75_v24 = vld [vmem:[#allocation2 + $0x90] sm:$0xff] }
  0xad   :  { %5735 = vmatprep.subr.bf16.mxu1 %v6463_v25  ;;  %v185_v25 = vpack.c.bf16 %v129_v23, %v73_v22  ;;  %v6552_v22 = vld [vmem:[#allocation5 + $0x618] sm:$0xff]  }
  0xae   :  { %v6553_v23 = vld [vmem:[#allocation5 + $0x698] sm:$0xff]  }
  0xaf   :  { %5714 = vmatpush3.bf16.msra.mxu0 %v6464_v26  ;;  %v131_v26 = vld [vmem:[#allocation2 + $0x250] sm:$0xff] }
  0xb0   :  { %5736 = vmatpush3.bf16.msra.mxu1 %v6465_v27  ;;  %5715 = vmatprep.subr.bf16.mxu0 %v6466_v28  ;;  %v187_v27 = vpack.c.bf16 %v131_v26, %v75_v24  ;;  %v6506_v28 = vld [vmem:[#allocation5 + $0x540] sm:$0xff]  }
  0xb1   :  { %5737 = vmatprep.subr.bf16.mxu1 %v6467_v29  ;;  %v6507_v29 = vld [vmem:[#allocation5 + $0x5c0] sm:$0xff]  }
  0xb2   :  { %v6554_v24 = vld [vmem:[#allocation5 + $0x660] sm:$0xff]  }
  0xb3   :  { %5716 = vmatpush3.bf16.msra.mxu0 %v6468_v30  ;;  %v6508_v30 = vld [vmem:[#allocation5 + $0x500] sm:$0xff]  }
  0xb4   :  { %5738 = vmatpush3.bf16.msra.mxu1 %v6469_v31  ;;  %5717 = vmatprep.subr.bf16.mxu0 %v6470_v32  ;;  %v6509_v31 = vld [vmem:[#allocation5 + $0x580] sm:$0xff]   ;;  %v6510_v32 = vld [vmem:[#allocation5 + $0x548] sm:$0xff]  }
  0xb5   :  { %5739 = vmatprep.subr.bf16.mxu1 %v6471_v33  ;;  %v6511_v33 = vld [vmem:[#allocation5 + $0x5c8] sm:$0xff]   ;;  %v6556_v26 = vld [vmem:[#allocation5 + $0x620] sm:$0xff]  }
  0xb7   :  { %5718 = vmatpush3.bf16.msra.mxu0 %v6472_v34  ;;  %v6512_v34 = vld [vmem:[#allocation5 + $0x508] sm:$0xff]  }
  0xb8   :  { %5740 = vmatpush3.bf16.msra.mxu1 %v6473_v35  ;;  %5747 = vmatprep.subr.bf16.mxu0 %v6474_v48  ;;  %v6513_v35 = vld [vmem:[#allocation5 + $0x588] sm:$0xff]  }
  0xb9   :  { %5769 = vmatprep.subr.bf16.mxu1 %v6475_v49  ;;  %v6526_v48 = vld [vmem:[#allocation5 + $0x568] sm:$0xff]  }
  0xba   :  { %4041 = vmatmul.mubr.bf16.vlgmr.msra.gmra.mrb[12].mxu0 %v181_v44  ;;  %v6522_v44 = vld [vmem:[#allocation5 + $0x560] sm:$0xff]   ;;  %v6527_v49 = vld [vmem:[#allocation5 + $0x5e8] sm:$0xff]  }
  0xbb   :  { %4082 = vmatmul.mubr.bf16.vlgmr.msra.gmra.mrb[12].mxu1 %v183_v47  ;;  %5748 = vmatpush3.bf16.msra.mxu0 %v6476_v50  ;;  %v6525_v47 = vld [vmem:[#allocation5 + $0x5a0] sm:$0xff]   ;;  %v6528_v50 = vld [vmem:[#allocation5 + $0x528] sm:$0xff]  }
  0xbc   :  { %5770 = vmatpush3.bf16.msra.mxu1 %v6477_v51  ;;  %5749 = vmatprep.subr.bf16.mxu0 %v6478_v52  ;;  %v6529_v51 = vld [vmem:[#allocation5 + $0x5a8] sm:$0xff]   ;;  %v6530_v52 = vld [vmem:[#allocation5 + $0x570] sm:$0xff]  }
  0xbd   :  { %5771 = vmatprep.subr.bf16.mxu1 %v6479_v53  ;;  %4122 = vmatprep.mubr.bf16.mxu0 %v186_v20  ;;  %v6531_v53 = vld [vmem:[#allocation5 + $0x5f0] sm:$0xff]   ;;  %v6550_v20 = vld [vmem:[#allocation5 + $0x658] sm:$0xff]  }
  0xbe   :  { %4163 = vmatprep.mubr.bf16.mxu1 %v188_v21  ;;  %v6551_v21 = vld [vmem:[#allocation5 + $0x6d8] sm:$0xff]  }
  0xbf   :  { %5750 = vmatpush3.bf16.msra.mxu0 %v6480_v54  ;;  %v6532_v54 = vld [vmem:[#allocation5 + $0x530] sm:$0xff]  }
  0xc0   :  { %5772 = vmatpush3.bf16.msra.mxu1 %v6481_v55  ;;  %5751 = vmatprep.subr.bf16.mxu0 %v6482_v56  ;;  %v6533_v55 = vld [vmem:[#allocation5 + $0x5b0] sm:$0xff]   ;;  %v6534_v56 = vld [vmem:[#allocation5 + $0x578] sm:$0xff]  }
  0xc1   :  { %5773 = vmatprep.subr.bf16.mxu1 %v6483_v57  ;;  %v6535_v57 = vld [vmem:[#allocation5 + $0x5f8] sm:$0xff]  }
  0xc3   :  { %5752 = vmatpush3.bf16.msra.mxu0 %v6484_v58  ;;  %v6536_v58 = vld [vmem:[#allocation5 + $0x538] sm:$0xff]  }
  0xc4   :  { %5774 = vmatpush3.bf16.msra.mxu1 %v6485_v59  ;;  %5753 = vmatprep.subr.bf16.mxu0 %v6486_v60  ;;  %v6537_v59 = vld [vmem:[#allocation5 + $0x5b8] sm:$0xff]   ;;  %v78_v60 = vld [vmem:[#allocation2 + $0xa8] sm:$0xff] }
  0xc5   :  { %5775 = vmatprep.subr.bf16.mxu1 %v6487_v61  ;;  %v134_v61 = vld [vmem:[#allocation2 + $0x268] sm:$0xff] }
  0xc7   :  { %5754 = vmatpush3.bf16.msra.mxu0 %v6488_v62  ;;  %v190_v62 = vpack.c.bf16 %v134_v61, %v78_v60  ;;  %v6576_v60 = vld [vmem:[#allocation5 + $0x708] sm:$0xff]  }
  0xc8   :  { %5776 = vmatpush3.bf16.msra.mxu1 %v6489_v63  ;;  %5755 = vmatprep.subr.bf16.mxu0 %v6490_v0  ;;  %v80_v63 = vld [vmem:[#allocation2 + $0xb8] sm:$0xff] }
  0xc9   :  { %5777 = vmatprep.subr.bf16.mxu1 %v6491_v1  ;;  %v136_v0 = vld [vmem:[#allocation2 + $0x278] sm:$0xff]  ;;  %v77_v1 = vld [vmem:[#allocation2 + $0xa0] sm:$0xff] }
  0xcb   :  { %5756 = vmatpush3.bf16.msra.mxu0 %v6492_v2  ;;  %v192_v2 = vpack.c.bf16 %v136_v0, %v80_v63 }
  0xcc   :  { %5778 = vmatpush3.bf16.msra.mxu1 %v6493_v3  ;;  %5757 = vmatprep.subr.bf16.mxu0 %v6494_v4  ;;  %v133_v3 = vld [vmem:[#allocation2 + $0x260] sm:$0xff]  ;;  %v79_v4 = vld [vmem:[#allocation2 + $0xb0] sm:$0xff] }
  0xcd   :  { %5779 = vmatprep.subr.bf16.mxu1 %v6495_v5  ;;  %v135_v5 = vld [vmem:[#allocation2 + $0x270] sm:$0xff] }
  0xcf   :  { %5758 = vmatpush3.bf16.msra.mxu0 %v6496_v6  ;;  %v189_v6 = vpack.c.bf16 %v133_v3, %v77_v1  ;;  %v6578_v1 = vld [vmem:[#allocation5 + $0x750] sm:$0xff]  }
  0xd0   :  { %5780 = vmatpush3.bf16.msra.mxu1 %v6497_v7  ;;  %5759 = vmatprep.subr.bf16.mxu0 %v6498_v8  ;;  %v191_v7 = vpack.c.bf16 %v135_v5, %v79_v4  ;;  %v6538_v8 = vld [vmem:[#allocation5 + $0x640] sm:$0xff]   ;;  %v6579_v4 = vld [vmem:[#allocation5 + $0x7d0] sm:$0xff]  }
  0xd1   :  { %5781 = vmatprep.subr.bf16.mxu1 %v6499_v9  ;;  %v6539_v9 = vld [vmem:[#allocation5 + $0x6c0] sm:$0xff]  }
  0xd3   :  { %5760 = vmatpush3.bf16.msra.mxu0 %v6500_v10  ;;  %v6540_v10 = vld [vmem:[#allocation5 + $0x600] sm:$0xff]  }
  0xd4   :  { %5782 = vmatpush3.bf16.msra.mxu1 %v6501_v11  ;;  %5761 = vmatprep.subr.bf16.mxu0 %v6502_v12  ;;  %v6541_v11 = vld [vmem:[#allocation5 + $0x680] sm:$0xff]   ;;  %v6542_v12 = vld [vmem:[#allocation5 + $0x648] sm:$0xff]  }
  0xd5   :  { %5783 = vmatprep.subr.bf16.mxu1 %v6503_v13  ;;  %v6543_v13 = vld [vmem:[#allocation5 + $0x6c8] sm:$0xff]  }
  0xd7   :  { %5762 = vmatpush3.bf16.msra.mxu0 %v6504_v14  ;;  %v6544_v14 = vld [vmem:[#allocation5 + $0x608] sm:$0xff]  }
  0xd8   :  { %5784 = vmatpush3.bf16.msra.mxu1 %v6505_v15  ;;  %5791 = vmatprep.subr.bf16.mxu0 %v6506_v28  ;;  %v6545_v15 = vld [vmem:[#allocation5 + $0x688] sm:$0xff]  }
  0xd9   :  { %5813 = vmatprep.subr.bf16.mxu1 %v6507_v29  ;;  %v6558_v28 = vld [vmem:[#allocation5 + $0x668] sm:$0xff]  }
  0xda   :  { %4123 = vmatmul.mubr.bf16.vlgmr.msra.gmra.mrb[16].mxu0 %v185_v25  ;;  %v6555_v25 = vld [vmem:[#allocation5 + $0x6e0] sm:$0xff]   ;;  %v6559_v29 = vld [vmem:[#allocation5 + $0x6e8] sm:$0xff]  }
  0xdb   :  { %4164 = vmatmul.mubr.bf16.vlgmr.msra.gmra.mrb[16].mxu1 %v187_v27  ;;  %5792 = vmatpush3.bf16.msra.mxu0 %v6508_v30  ;;  %v6557_v27 = vld [vmem:[#allocation5 + $0x6a0] sm:$0xff]   ;;  %v6560_v30 = vld [vmem:[#allocation5 + $0x628] sm:$0xff]  }
  0xdc   :  { %5814 = vmatpush3.bf16.msra.mxu1 %v6509_v31  ;;  %5793 = vmatprep.subr.bf16.mxu0 %v6510_v32  ;;  %v6561_v31 = vld [vmem:[#allocation5 + $0x6a8] sm:$0xff]   ;;  %v6562_v32 = vld [vmem:[#allocation5 + $0x670] sm:$0xff]  }
  0xdd   :  { %5815 = vmatprep.subr.bf16.mxu1 %v6511_v33  ;;  %4204 = vmatprep.mubr.bf16.mxu0 %v190_v62  ;;  %v6563_v33 = vld [vmem:[#allocation5 + $0x6f0] sm:$0xff]   ;;  %v6577_v62 = vld [vmem:[#allocation5 + $0x788] sm:$0xff]  }
  0xde   :  { %4245 = vmatprep.mubr.bf16.mxu1 %v192_v2 }
  0xdf   :  { %5794 = vmatpush3.bf16.msra.mxu0 %v6512_v34  ;;  %v6564_v34 = vld [vmem:[#allocation5 + $0x630] sm:$0xff]  }
  0xe0   :  { %5816 = vmatpush3.bf16.msra.mxu1 %v6513_v35  ;;  %5795 = vmatprep.subr.bf16.mxu0 %v6514_v36  ;;  %v6565_v35 = vld [vmem:[#allocation5 + $0x6b0] sm:$0xff]   ;;  %v6566_v36 = vld [vmem:[#allocation5 + $0x678] sm:$0xff]  }
  0xe1   :  { %5817 = vmatprep.subr.bf16.mxu1 %v6515_v37  ;;  %v6567_v37 = vld [vmem:[#allocation5 + $0x6f8] sm:$0xff]  }
  0xe3   :  { %5796 = vmatpush3.bf16.msra.mxu0 %v6516_v38  ;;  %v6568_v38 = vld [vmem:[#allocation5 + $0x638] sm:$0xff]  }
  0xe4   :  { %5818 = vmatpush3.bf16.msra.mxu1 %v6517_v39  ;;  %5797 = vmatprep.subr.bf16.mxu0 %v6518_v40  ;;  %v6569_v39 = vld [vmem:[#allocation5 + $0x6b8] sm:$0xff]   ;;  %v82_v40 = vld [vmem:[#allocation2 + $0xc8] sm:$0xff] }
  0xe5   :  { %5819 = vmatprep.subr.bf16.mxu1 %v6519_v41  ;;  %v138_v41 = vld [vmem:[#allocation2 + $0x288] sm:$0xff] }
  0xe7   :  { %5798 = vmatpush3.bf16.msra.mxu0 %v6520_v42  ;;  %v84_v42 = vld [vmem:[#allocation2 + $0xd8] sm:$0xff] }
  0xe8   :  { %5820 = vmatpush3.bf16.msra.mxu1 %v6521_v43  ;;  %5799 = vmatprep.subr.bf16.mxu0 %v6522_v44  ;;  %v194_v43 = vpack.c.bf16 %v138_v41, %v82_v40  ;;  %v140_v44 = vld [vmem:[#allocation2 + $0x298] sm:$0xff] }
  0xe9   :  { %5821 = vmatprep.subr.bf16.mxu1 %v6523_v45  ;;  %v81_v45 = vld [vmem:[#allocation2 + $0xc0] sm:$0xff]  ;;  %v144_v41 = vld [vmem:[#allocation2 + $0x2b8] sm:$0xff] }
  0xeb   :  { %5800 = vmatpush3.bf16.msra.mxu0 %v6524_v46  ;;  %v137_v46 = vld [vmem:[#allocation2 + $0x280] sm:$0xff] }
  0xec   :  { %5822 = vmatpush3.bf16.msra.mxu1 %v6525_v47  ;;  %5801 = vmatprep.subr.bf16.mxu0 %v6526_v48  ;;  %v196_v47 = vpack.c.bf16 %v140_v44, %v84_v42  ;;  %v193_v48 = vpack.c.bf16 %v137_v46, %v81_v45  ;;  %v85_v42 = vld [vmem:[#allocation2 + $0xe0] sm:$0xff]  ;;  %v87_v46 = vld [vmem:[#allocation2 + $0xf0] sm:$0xff] }
  0xed   :  { %5823 = vmatprep.subr.bf16.mxu1 %v6527_v49  ;;  %v83_v49 = vld [vmem:[#allocation2 + $0xd0] sm:$0xff] }
  0xef   :  { %5802 = vmatpush3.bf16.msra.mxu0 %v6528_v50  ;;  %v139_v50 = vld [vmem:[#allocation2 + $0x290] sm:$0xff] }
  0xf0   :  { %5824 = vmatpush3.bf16.msra.mxu1 %v6529_v51  ;;  %5803 = vmatprep.subr.bf16.mxu0 %v6530_v52  ;;  %v195_v51 = vpack.c.bf16 %v139_v50, %v83_v49  ;;  %v6570_v52 = vld [vmem:[#allocation5 + $0x740] sm:$0xff]  }
  0xf1   :  { %5825 = vmatprep.subr.bf16.mxu1 %v6531_v53  ;;  %v6571_v53 = vld [vmem:[#allocation5 + $0x7c0] sm:$0xff]  }
  0xf2   :  { %v6602_v49 = vld [vmem:[#allocation5 + $0x840] sm:$0xff]  }
  0xf3   :  { %5804 = vmatpush3.bf16.msra.mxu0 %v6532_v54  ;;  %v6572_v54 = vld [vmem:[#allocation5 + $0x700] sm:$0xff]  }
  0xf4   :  { %5826 = vmatpush3.bf16.msra.mxu1 %v6533_v55  ;;  %5805 = vmatprep.subr.bf16.mxu0 %v6534_v56  ;;  %v6573_v55 = vld [vmem:[#allocation5 + $0x780] sm:$0xff]   ;;  %v6574_v56 = vld [vmem:[#allocation5 + $0x748] sm:$0xff]  }
  0xf5   :  { %5827 = vmatprep.subr.bf16.mxu1 %v6535_v57  ;;  %v6603_v50 = vld [vmem:[#allocation5 + $0x8c0] sm:$0xff]  }
  0xf7   :  { %5806 = vmatpush3.bf16.msra.mxu0 %v6536_v58  ;;  %v6575_v58 = vld [vmem:[#allocation5 + $0x7c8] sm:$0xff]  }
  0xf8   :  { %5828 = vmatpush3.bf16.msra.mxu1 %v6537_v59  ;;  %5835 = vmatprep.subr.bf16.mxu0 %v6538_v8  ;;  %v6581_v8 = vld [vmem:[#allocation5 + $0x790] sm:$0xff]  }
  0xf9   :  { %5857 = vmatprep.subr.bf16.mxu1 %v6539_v9 }
  0xfa   :  { %4205 = vmatmul.mubr.bf16.vlgmr.msra.gmra.mrb[20].mxu0 %v189_v6  ;;  %v6580_v6 = vld [vmem:[#allocation5 + $0x710] sm:$0xff]  }
  0xfb   :  { %4246 = vmatmul.mubr.bf16.vlgmr.msra.gmra.mrb[20].mxu1 %v191_v7  ;;  %5836 = vmatpush3.bf16.msra.mxu0 %v6540_v10 }
  0xfc   :  { %5858 = vmatpush3.bf16.msra.mxu1 %v6541_v11  ;;  %5837 = vmatprep.subr.bf16.mxu0 %v6542_v12  ;;  %v6582_v11 = vld [vmem:[#allocation5 + $0x758] sm:$0xff]  }
  0xfd   :  { %5859 = vmatprep.subr.bf16.mxu1 %v6543_v13  ;;  %4286 = vmatprep.mubr.bf16.mxu0 %v194_v43  ;;  %v6583_v13 = vld [vmem:[#allocation5 + $0x7d8] sm:$0xff]   ;;  %v141_v43 = vld [vmem:[#allocation2 + $0x2a0] sm:$0xff] }
  0xfe   :  { %4327 = vmatprep.mubr.bf16.mxu1 %v196_v47  ;;  %v197_v45 = vpack.c.bf16 %v141_v43, %v85_v42  ;;  %v143_v47 = vld [vmem:[#allocation2 + $0x2b0] sm:$0xff] }
  0xff   :  { %5838 = vmatpush3.bf16.msra.mxu0 %v6544_v14  ;;  %v6584_v14 = vld [vmem:[#allocation5 + $0x718] sm:$0xff]   ;;  %v147_v43 = vld [vmem:[#allocation2 + $0x2d0] sm:$0xff] }
 0x100   :  { %5860 = vmatpush3.bf16.msra.mxu1 %v6545_v15  ;;  %5839 = vmatprep.subr.bf16.mxu0 %v6546_v16  ;;  %v6585_v15 = vld [vmem:[#allocation5 + $0x798] sm:$0xff]   ;;  %v6586_v16 = vld [vmem:[#allocation5 + $0x760] sm:$0xff]  }
 0x101   :  { %5861 = vmatprep.subr.bf16.mxu1 %v6547_v17  ;;  %v6587_v17 = vld [vmem:[#allocation5 + $0x7e0] sm:$0xff]  }
 0x103   :  { %5840 = vmatpush3.bf16.msra.mxu0 %v6548_v18  ;;  %v6588_v18 = vld [vmem:[#allocation5 + $0x720] sm:$0xff]  }
 0x104   :  { %5862 = vmatpush3.bf16.msra.mxu1 %v6549_v19  ;;  %5841 = vmatprep.subr.bf16.mxu0 %v6550_v20  ;;  %v6589_v19 = vld [vmem:[#allocation5 + $0x7a0] sm:$0xff]   ;;  %v5126_v20 = vld [vmem:[#allocation7] ss:$0 sm:$0xff] }
 0x105   :  { %5863 = vmatprep.subr.bf16.mxu1 %v6551_v21 }
 0x107   :  { %5842 = vmatpush3.bf16.msra.mxu0 %v6552_v22  ;;  %v6590_v22 = vld [vmem:[#allocation5 + $0x768] sm:$0xff]  }
 0x108   :  { %5864 = vmatpush3.bf16.msra.mxu1 %v6553_v23  ;;  %5843 = vmatprep.subr.bf16.mxu0 %v6554_v24  ;;  %v6591_v24 = vld [vmem:[#allocation5 + $0x7e8] sm:$0xff]  }
 0x109   :  { %5865 = vmatprep.subr.bf16.mxu1 %v6555_v25 }
 0x10b   :  { %5844 = vmatpush3.bf16.msra.mxu0 %v6556_v26  ;;  %v6592_v26 = vld [vmem:[#allocation5 + $0x728] sm:$0xff]  }
 0x10c   :  { %5866 = vmatpush3.bf16.msra.mxu1 %v6557_v27  ;;  %5845 = vmatprep.subr.bf16.mxu0 %v6558_v28  ;;  %v6593_v28 = vld [vmem:[#allocation5 + $0x7a8] sm:$0xff]  }
 0x10d   :  { %5867 = vmatprep.subr.bf16.mxu1 %v6559_v29  ;;  %v6594_v29 = vld [vmem:[#allocation5 + $0x770] sm:$0xff]  }
 0x10f   :  { %5846 = vmatpush3.bf16.msra.mxu0 %v6560_v30  ;;  %v6595_v30 = vld [vmem:[#allocation5 + $0x7f0] sm:$0xff]  }
 0x110   :  { %5868 = vmatpush3.bf16.msra.mxu1 %v6561_v31  ;;  %5847 = vmatprep.subr.bf16.mxu0 %v6562_v32  ;;  %v6596_v31 = vld [vmem:[#allocation5 + $0x730] sm:$0xff]  }
 0x111   :  { %5869 = vmatprep.subr.bf16.mxu1 %v6563_v33  ;;  %v6597_v32 = vld [vmem:[#allocation5 + $0x7b0] sm:$0xff]   ;;  %v6598_v33 = vld [vmem:[#allocation5 + $0x778] sm:$0xff]  }
 0x113   :  { %5848 = vmatpush3.bf16.msra.mxu0 %v6564_v34  ;;  %v6599_v34 = vld [vmem:[#allocation5 + $0x7f8] sm:$0xff]  }
 0x114   :  { %5870 = vmatpush3.bf16.msra.mxu1 %v6565_v35  ;;  %5849 = vmatprep.subr.bf16.mxu0 %v6566_v36  ;;  %v6600_v35 = vld [vmem:[#allocation5 + $0x738] sm:$0xff]  }
 0x115   :  { %5871 = vmatprep.subr.bf16.mxu1 %v6567_v37  ;;  %v6601_v36 = vld [vmem:[#allocation5 + $0x7b8] sm:$0xff]   ;;  %v86_v37 = vld [vmem:[#allocation2 + $0xe8] sm:$0xff] }
 0x117   :  { %5850 = vmatpush3.bf16.msra.mxu0 %v6568_v38  ;;  %v142_v38 = vld [vmem:[#allocation2 + $0x2a8] sm:$0xff] }
 0x118   :  { %5872 = vmatpush3.bf16.msra.mxu1 %v6569_v39  ;;  %5879 = vmatprep.subr.bf16.mxu0 %v6570_v52  ;;  %v88_v39 = vld [vmem:[#allocation2 + $0xf8] sm:$0xff]  ;;  %v198_v40 = vpack.c.bf16 %v142_v38, %v86_v37  ;;  %v6605_v52 = vld [vmem:[#allocation5 + $0x880] sm:$0xff]  }
 0x119   :  { %5901 = vmatprep.subr.bf16.mxu1 %v6571_v53  ;;  %v200_v44 = vpack.c.bf16 %v144_v41, %v88_v39  ;;  %v6606_v53 = vld [vmem:[#allocation5 + $0x848] sm:$0xff]   ;;  %v89_v39 = vld [vmem:[#allocation2 + $0x100] sm:$0xff]  ;;  %v91_v41 = vld [vmem:[#allocation2 + $0x110] sm:$0xff] }
 0x11a   :  { %4287 = vmatmul.mubr.bf16.vlgmr.msra.gmra.mrb[24].mxu0 %v193_v48  ;;  %v199_v48 = vpack.c.bf16 %v143_v47, %v87_v46  ;;  %v6635_v46 = vld [vmem:[#allocation5 + $0x9c0] sm:$0xff]  }
 0x11b   :  { %4328 = vmatmul.mubr.bf16.vlgmr.msra.gmra.mrb[24].mxu1 %v195_v51  ;;  %5880 = vmatpush3.bf16.msra.mxu0 %v6572_v54  ;;  %v6604_v51 = vld [vmem:[#allocation5 + $0x800] sm:$0xff]  }
 0x11c   :  { %5902 = vmatpush3.bf16.msra.mxu1 %v6573_v55  ;;  %5881 = vmatprep.subr.bf16.mxu0 %v6574_v56  ;;  %v6607_v55 = vld [vmem:[#allocation5 + $0x8c8] sm:$0xff]   ;;  %v6636_v47 = vld [vmem:[#allocation5 + $0x900] sm:$0xff]  }
 0x11d   :  { %5903 = vmatprep.subr.bf16.mxu1 %v6575_v58  ;;  %4368 = vmatprep.mubr.bf16.mxu0 %v198_v40  ;;  %v145_v40 = vld [vmem:[#allocation2 + $0x2c0] sm:$0xff] }
 0x11e   :  { %4409 = vmatprep.mubr.bf16.mxu1 %v200_v44  ;;  %v201_v42 = vpack.c.bf16 %v145_v40, %v89_v39  ;;  %v203_v44 = vpack.c.bf16 %v147_v43, %v91_v41  ;;  %v6666_v41 = vld [vmem:[#allocation5 + $0xa40] sm:$0xff]  }
 0x11f   :  { %5882 = vmatpush3.bf16.msra.mxu0 %v6576_v60  ;;  %v6668_v43 = vld [vmem:[#allocation5 + $0xa00] sm:$0xff]  }
 0x120   :  { %5904 = vmatpush3.bf16.msra.mxu1 %v6577_v62  ;;  %5883 = vmatprep.subr.bf16.mxu0 %v6578_v1  ;;  %v6610_v62 = vld [vmem:[#allocation5 + $0x850] sm:$0xff]  }
 0x121   :  { %5905 = vmatprep.subr.bf16.mxu1 %v6579_v4  ;;  %v6611_v1 = vld [vmem:[#allocation5 + $0x8d0] sm:$0xff]  }
 0x122   :  { %v6612_v4 = vld [vmem:[#allocation5 + $0x810] sm:$0xff]  }
 0x123   :  { %5884 = vmatpush3.bf16.msra.mxu0 %v6580_v6  ;;  %v6613_v6 = vld [vmem:[#allocation5 + $0x890] sm:$0xff]  }
 0x124   :  { %5906 = vmatpush3.bf16.msra.mxu1 %v6581_v8  ;;  %5885 = vmatprep.subr.bf16.mxu0 %v6582_v11 }
 0x125   :  { %5907 = vmatprep.subr.bf16.mxu1 %v6583_v13 }
 0x127   :  { %5886 = vmatpush3.bf16.msra.mxu0 %v6584_v14  ;;  %v6616_v14 = vld [vmem:[#allocation5 + $0x818] sm:$0xff]  }
 0x128   :  { %5908 = vmatpush3.bf16.msra.mxu1 %v6585_v15  ;;  %5887 = vmatprep.subr.bf16.mxu0 %v6586_v16  ;;  %v6617_v15 = vld [vmem:[#allocation5 + $0x898] sm:$0xff]  }
 0x129   :  { %5909 = vmatprep.subr.bf16.mxu1 %v6587_v17  ;;  %v6618_v17 = vld [vmem:[#allocation5 + $0x860] sm:$0xff]  }
 0x12b   :  { %5888 = vmatpush3.bf16.msra.mxu0 %v6588_v18  ;;  %v6619_v18 = vld [vmem:[#allocation5 + $0x8e0] sm:$0xff]  }
 0x12c   :  { %5910 = vmatpush3.bf16.msra.mxu1 %v6589_v19  ;;  %5889 = vmatprep.subr.bf16.mxu0 %v6590_v22  ;;  %v6620_v19 = vld [vmem:[#allocation5 + $0x820] sm:$0xff]   ;;  %v6623_v22 = vld [vmem:[#allocation5 + $0x8e8] sm:$0xff]  }
 0x12d   :  { %v5587_v57 = vpop.f32.mrb[0].mxu0  ;;  %5911 = vmatprep.subr.bf16.mxu1 %v6591_v24  ;;  %v6625_v24 = vld [vmem:[#allocation5 + $0x8a8] sm:$0xff]  }
 0x12e   :  { %v5609_v59 = vpop.f32.mrb[0].mxu1  ;;  %v5588_v61 = vpop.f32.mrb[1].mxu0 }
 0x12f   :  { %v5589_v63 = vadd.f32 %v5588_v61, %v5587_v57  ;;  %v5610_v0 = vpop.f32.mrb[1].mxu1  ;;  %v5590_v3 = vpop.f32.mrb[2].mxu0  ;;  %5890 = vmatpush3.bf16.msra.mxu0 %v6592_v26  ;;  %v6608_v57 = vld [vmem:[#allocation5 + $0x808] sm:$0xff]   ;;  %v6627_v26 = vld [vmem:[#allocation5 + $0x8f0] sm:$0xff]  }
 0x130   :  { %v5611_v2 = vadd.f32 %v5610_v0, %v5609_v59  ;;  %v5612_v5 = vpop.f32.mrb[2].mxu1  ;;  %v5591_v7 = vpop.f32.mrb[3].mxu0  ;;  %5912 = vmatpush3.bf16.msra.mxu1 %v6593_v28  ;;  %5891 = vmatprep.subr.bf16.mxu0 %v6594_v29  ;;  %v6609_v59 = vld [vmem:[#allocation5 + $0x888] sm:$0xff]   ;;  %v6629_v28 = vld [vmem:[#allocation5 + $0x8b0] sm:$0xff]   ;;  %v6630_v29 = vld [vmem:[#allocation5 + $0x878] sm:$0xff]  }
 0x131   :  { %v5592_v9 = vadd.f32 %v5591_v7, %v5590_v3  ;;  %v5613_v10 = vpop.f32.mrb[3].mxu1  ;;  %v3797_v21 = vadd.f32 %v5589_v63, %v5126_v20  ;;  %5913 = vmatprep.subr.bf16.mxu1 %v6595_v30  ;;  %v6631_v30 = vld [vmem:[#allocation5 + $0x8f8] sm:$0xff]  }
 0x132   :  { %v5614_v12 = vadd.f32 %v5613_v10, %v5612_v5  ;;  %v6614_v10 = vld [vmem:[#allocation5 + $0x858] sm:$0xff]  }
 0x133   :  { %v3800_v23 = vadd.f32 %v5592_v9, %v5126_v20  ;;  %v6951_v25 = vadd.f32 %v5611_v2, %v3797_v21  ;;  %5892 = vmatpush3.bf16.msra.mxu0 %v6596_v31  ;;  %v6621_v20 = vld [vmem:[#allocation5 + $0x8a0] sm:$0xff]   ;;  %v6622_v21 = vld [vmem:[#allocation5 + $0x868] sm:$0xff]   ;;  %v6632_v31 = vld [vmem:[#allocation5 + $0x838] sm:$0xff]  }
 0x134   :  { %5914 = vmatpush3.bf16.msra.mxu1 %v6597_v32  ;;  %5893 = vmatprep.subr.bf16.mxu0 %v6598_v33  ;;  %v6633_v32 = vld [vmem:[#allocation5 + $0x8b8] sm:$0xff]   ;;  %v90_v33 = vld [vmem:[#allocation2 + $0x108] sm:$0xff] }
 0x135   :  { %v6953_v27 = vadd.f32 %v5614_v12, %v3800_v23  ;;  %5915 = vmatprep.subr.bf16.mxu1 %v6599_v34  ;;  %v6615_v12 = vld [vmem:[#allocation5 + $0x8d8] sm:$0xff]   ;;  %v6624_v23 = vld [vmem:[#allocation5 + $0x828] sm:$0xff]  }
 0x136   :  { %v146_v34 = vld [vmem:[#allocation2 + $0x2c8] sm:$0xff] }
 0x137   :  { %5894 = vmatpush3.bf16.msra.mxu0 %v6600_v35  ;;  %v92_v35 = vld [vmem:[#allocation2 + $0x118] sm:$0xff]  ;;  %v202_v37 = vpack.c.bf16 %v146_v34, %v90_v33  ;;  %v93_v34 = vld [vmem:[#allocation2 + $0x120] sm:$0xff] }
 0x138   :  { %5916 = vmatpush3.bf16.msra.mxu1 %v6601_v36  ;;  %5923 = vmatprep.subr.bf16.mxu0 %v6602_v49  ;;  %v148_v36 = vld [vmem:[#allocation2 + $0x2d8] sm:$0xff]  ;;  %v6638_v49 = vld [vmem:[#allocation5 + $0x948] sm:$0xff]  }
 0x139   :  { %5945 = vmatprep.subr.bf16.mxu1 %v6603_v50  ;;  %v204_v38 = vpack.c.bf16 %v148_v36, %v92_v35  ;;  %v152_v33 = vld [vmem:[#allocation2 + $0x2f8] sm:$0xff]  ;;  %v149_v36 = vld [vmem:[#allocation2 + $0x2e0] sm:$0xff] }
 0x13a   :  { %4369 = vmatmul.mubr.bf16.vlgmr.msra.gmra.mrb[28].mxu0 %v197_v45  ;;  %v6634_v45 = vld [vmem:[#allocation5 + $0x940] sm:$0xff]   ;;  %v205_v39 = vpack.c.bf16 %v149_v36, %v93_v34  ;;  %v99_v34 = vld [vmem:[#allocation2 + $0x150] sm:$0xff] }
 0x13b   :  { %4410 = vmatmul.mubr.bf16.vlgmr.msra.gmra.mrb[28].mxu1 %v199_v48  ;;  %5924 = vmatpush3.bf16.msra.mxu0 %v6604_v51  ;;  %v6637_v48 = vld [vmem:[#allocation5 + $0x980] sm:$0xff]   ;;  %v6639_v51 = vld [vmem:[#allocation5 + $0x9c8] sm:$0xff]  }
 0x13c   :  { %5946 = vmatpush3.bf16.msra.mxu1 %v6605_v52  ;;  %5925 = vmatprep.subr.bf16.mxu0 %v6606_v53  ;;  %v6640_v53 = vld [vmem:[#allocation5 + $0x908] sm:$0xff]  }
 0x13d   :  { %5947 = vmatprep.subr.bf16.mxu1 %v6607_v55  ;;  %4450 = vmatprep.mubr.bf16.mxu0 %v202_v37  ;;  %v6641_v55 = vld [vmem:[#allocation5 + $0x988] sm:$0xff]   ;;  %v95_v37 = vld [vmem:[#allocation2 + $0x130] sm:$0xff] }
 0x13e   :  { %4491 = vmatprep.mubr.bf16.mxu1 %v204_v38  ;;  %v151_v38 = vld [vmem:[#allocation2 + $0x2f0] sm:$0xff] }
 0x13f   :  { %5926 = vmatpush3.bf16.msra.mxu0 %v6608_v57  ;;  %v207_v40 = vpack.c.bf16 %v151_v38, %v95_v37  ;;  %v6698_v37 = vld [vmem:[#allocation5 + $0xb40] sm:$0xff]  }
 0x140   :  { %5948 = vmatpush3.bf16.msra.mxu1 %v6609_v59  ;;  %5927 = vmatprep.subr.bf16.mxu0 %v6610_v62  ;;  %v6699_v38 = vld [vmem:[#allocation5 + $0xbc0] sm:$0xff]  }
 0x141   :  { %5949 = vmatprep.subr.bf16.mxu1 %v6611_v1 }
 0x143   :  { %5928 = vmatpush3.bf16.msra.mxu0 %v6612_v4 }
 0x144   :  { %5950 = vmatpush3.bf16.msra.mxu1 %v6613_v6  ;;  %5929 = vmatprep.subr.bf16.mxu0 %v6614_v10  ;;  %v6646_v6 = vld [vmem:[#allocation5 + $0x958] sm:$0xff]  }
 0x145   :  { %5951 = vmatprep.subr.bf16.mxu1 %v6615_v12 }
 0x147   :  { %5930 = vmatpush3.bf16.msra.mxu0 %v6616_v14  ;;  %v6651_v14 = vld [vmem:[#allocation5 + $0x9e0] sm:$0xff]  }
 0x148   :  { %5952 = vmatpush3.bf16.msra.mxu1 %v6617_v15  ;;  %5931 = vmatprep.subr.bf16.mxu0 %v6618_v17  ;;  %v6652_v15 = vld [vmem:[#allocation5 + $0x920] sm:$0xff]  }
 0x149   :  { %5953 = vmatprep.subr.bf16.mxu1 %v6619_v18  ;;  %v6653_v17 = vld [vmem:[#allocation5 + $0x9a0] sm:$0xff]   ;;  %v6654_v18 = vld [vmem:[#allocation5 + $0x968] sm:$0xff]  }
 0x14b   :  { %5932 = vmatpush3.bf16.msra.mxu0 %v6620_v19  ;;  %v6655_v19 = vld [vmem:[#allocation5 + $0x9e8] sm:$0xff]  }
 0x14c   :  { %5954 = vmatpush3.bf16.msra.mxu1 %v6621_v20  ;;  %5933 = vmatprep.subr.bf16.mxu0 %v6622_v21  ;;  %v6657_v20 = vld [vmem:[#allocation5 + $0x9a8] sm:$0xff]   ;;  %v6658_v21 = vld [vmem:[#allocation5 + $0x970] sm:$0xff]  }
 0x14d   :  { %v5631_v54 = vpop.f32.mrb[4].mxu0  ;;  %5955 = vmatprep.subr.bf16.mxu1 %v6623_v22  ;;  %v6659_v22 = vld [vmem:[#allocation5 + $0x9f0] sm:$0xff]  }
 0x14e   :  { %v5653_v56 = vpop.f32.mrb[4].mxu1  ;;  %v5632_v58 = vpop.f32.mrb[5].mxu0 }
 0x14f   :  { %v5633_v60 = vadd.f32 %v5632_v58, %v5631_v54  ;;  %v5654_v61 = vpop.f32.mrb[5].mxu1  ;;  %v5634_v0 = vpop.f32.mrb[6].mxu0  ;;  %5934 = vmatpush3.bf16.msra.mxu0 %v6624_v23  ;;  %v6642_v58 = vld [vmem:[#allocation5 + $0x950] sm:$0xff]  }
 0x150   :  { %v5655_v63 = vadd.f32 %v5654_v61, %v5653_v56  ;;  %v5656_v3 = vpop.f32.mrb[6].mxu1  ;;  %v5635_v5 = vpop.f32.mrb[7].mxu0  ;;  %5956 = vmatpush3.bf16.msra.mxu1 %v6625_v24  ;;  %v6643_v61 = vld [vmem:[#allocation5 + $0x9d0] sm:$0xff]  }
 0x151   :  { %v3879_v2 = vadd.f32 %v5633_v60, %v6951_v25  ;;  %v5636_v8 = vadd.f32 %v5635_v5, %v5634_v0  ;;  %v5657_v9 = vpop.f32.mrb[7].mxu1  ;;  %v6626_v25 = vld [vmem:[#allocation5 + $0x870] sm:$0xff]   ;;  %5957 = vmatprep.subr.bf16.mxu1 %v6627_v26  ;;  %v6663_v26 = vld [vmem:[#allocation5 + $0x9f8] sm:$0xff]  }
 0x152   :  { %v5658_v11 = vadd.f32 %v5657_v9, %v5656_v3  ;;  %5935 = vmatprep.subr.bf16.mxu0 %v6626_v25  ;;  %v6644_v0 = vld [vmem:[#allocation5 + $0x910] sm:$0xff]   ;;  %v6647_v9 = vld [vmem:[#allocation5 + $0x9d8] sm:$0xff]  }
 0x153   :  { %v6956_v7 = vadd.f32 %v5655_v63, %v3879_v2  ;;  %v3882_v13 = vadd.f32 %v5636_v8, %v6953_v27  ;;  %v6628_v27 = vld [vmem:[#allocation5 + $0x830] sm:$0xff]   ;;  %v6662_v25 = vld [vmem:[#allocation5 + $0x978] sm:$0xff]  }
 0x154   :  { %5936 = vmatpush3.bf16.msra.mxu0 %v6628_v27  ;;  %5958 = vmatpush3.bf16.msra.mxu1 %v6629_v28  ;;  %v6645_v2 = vld [vmem:[#allocation5 + $0x990] sm:$0xff]   ;;  %v6664_v27 = vld [vmem:[#allocation5 + $0x938] sm:$0xff]  }
 0x155   :  { %v6959_v16 = vadd.f32 %v5658_v11, %v3882_v13  ;;  %5937 = vmatprep.subr.bf16.mxu0 %v6630_v29  ;;  %5959 = vmatprep.subr.bf16.mxu1 %v6631_v30  ;;  %v6648_v11 = vld [vmem:[#allocation5 + $0x918] sm:$0xff]   ;;  %v6650_v13 = vld [vmem:[#allocation5 + $0x960] sm:$0xff]   ;;  %v6660_v23 = vld [vmem:[#allocation5 + $0x930] sm:$0xff]  }
 0x156   :  { %v6661_v24 = vld [vmem:[#allocation5 + $0x9b0] sm:$0xff]   ;;  %v6665_v28 = vld [vmem:[#allocation5 + $0x9b8] sm:$0xff]   ;;  %v94_v29 = vld [vmem:[#allocation2 + $0x128] sm:$0xff] }
 0x157   :  { %v150_v30 = vld [vmem:[#allocation2 + $0x2e8] sm:$0xff] }
 0x158   :  { %5938 = vmatpush3.bf16.msra.mxu0 %v6632_v31  ;;  %5960 = vmatpush3.bf16.msra.mxu1 %v6633_v32  ;;  %v206_v31 = vpack.c.bf16 %v150_v30, %v94_v29  ;;  %v96_v32 = vld [vmem:[#allocation2 + $0x138] sm:$0xff]  ;;  %v97_v30 = vld [vmem:[#allocation2 + $0x140] sm:$0xff] }
 0x159   :  { %5967 = vmatprep.subr.bf16.mxu0 %v6634_v45  ;;  %5989 = vmatprep.subr.bf16.mxu1 %v6635_v46  ;;  %v208_v35 = vpack.c.bf16 %v152_v33, %v96_v32  ;;  %v6670_v45 = vld [vmem:[#allocation5 + $0xa48] sm:$0xff]   ;;  %v156_v29 = vld [vmem:[#allocation2 + $0x318] sm:$0xff] }
 0x15b   :  { %4451 = vmatmul.mubr.bf16.vlgmr.msra.gmra.mrb[32].mxu0 %v201_v42  ;;  %4492 = vmatmul.mubr.bf16.vlgmr.msra.gmra.mrb[32].mxu1 %v203_v44  ;;  %v6667_v42 = vld [vmem:[#allocation5 + $0xac0] sm:$0xff]  }
 0x15c   :  { %5968 = vmatpush3.bf16.msra.mxu0 %v6636_v47  ;;  %5990 = vmatpush3.bf16.msra.mxu1 %v6637_v48  ;;  %v6669_v44 = vld [vmem:[#allocation5 + $0xa80] sm:$0xff]   ;;  %v6671_v47 = vld [vmem:[#allocation5 + $0xac8] sm:$0xff]  }
 0x15d   :  { %5969 = vmatprep.subr.bf16.mxu0 %v6638_v49  ;;  %5991 = vmatprep.subr.bf16.mxu1 %v6639_v51  ;;  %v6672_v49 = vld [vmem:[#allocation5 + $0xa08] sm:$0xff]  }
 0x15e   :  { %4532 = vmatprep.mubr.bf16.mxu0 %v206_v31  ;;  %4573 = vmatprep.mubr.bf16.mxu1 %v208_v35  ;;  %v6673_v51 = vld [vmem:[#allocation5 + $0xa88] sm:$0xff]   ;;  %v153_v31 = vld [vmem:[#allocation2 + $0x300] sm:$0xff]  ;;  %v155_v35 = vld [vmem:[#allocation2 + $0x310] sm:$0xff] }
 0x15f   :  { %v209_v33 = vpack.c.bf16 %v153_v31, %v97_v30  ;;  %v211_v36 = vpack.c.bf16 %v155_v35, %v99_v34  ;;  %v159_v31 = vld [vmem:[#allocation2 + $0x330] sm:$0xff]  ;;  %v6731_v34 = vld [vmem:[#allocation5 + $0xcc0] sm:$0xff]  }
 0x160   :  { %5970 = vmatpush3.bf16.msra.mxu0 %v6640_v53  ;;  %5992 = vmatpush3.bf16.msra.mxu1 %v6641_v55  ;;  %v6732_v35 = vld [vmem:[#allocation5 + $0xc00] sm:$0xff]  }
 0x161   :  { %5971 = vmatprep.subr.bf16.mxu0 %v6642_v58  ;;  %5993 = vmatprep.subr.bf16.mxu1 %v6643_v61 }
 0x164   :  { %5972 = vmatpush3.bf16.msra.mxu0 %v6644_v0  ;;  %5994 = vmatpush3.bf16.msra.mxu1 %v6645_v2  ;;  %v6678_v2 = vld [vmem:[#allocation5 + $0xa58] sm:$0xff]  }
 0x165   :  { %5973 = vmatprep.subr.bf16.mxu0 %v6646_v6  ;;  %5995 = vmatprep.subr.bf16.mxu1 %v6647_v9 }
 0x168   :  { %5974 = vmatpush3.bf16.msra.mxu0 %v6648_v11  ;;  %v6683_v11 = vld [vmem:[#allocation5 + $0xae0] sm:$0xff]  }
 0x169   :  { %5975 = vmatprep.subr.bf16.mxu0 %v6650_v13  ;;  %v6685_v13 = vld [vmem:[#allocation5 + $0xaa0] sm:$0xff]  }
 0x16c   :  { %5976 = vmatpush3.bf16.msra.mxu0 %v6652_v15  ;;  %v6687_v15 = vld [vmem:[#allocation5 + $0xae8] sm:$0xff]  }
 0x16d   :  { %v5675_v50 = vpop.f32.mrb[8].mxu0  ;;  %5977 = vmatprep.subr.bf16.mxu0 %v6654_v18  ;;  %v6690_v18 = vld [vmem:[#allocation5 + $0xa70] sm:$0xff]  }
 0x16e   :  { %v5697_v52 = vpop.f32.mrb[8].mxu1  ;;  %v5676_v54 = vpop.f32.mrb[9].mxu0 }
 0x16f   :  { %v5677_v56 = vadd.f32 %v5676_v54, %v5675_v50  ;;  %v5698_v57 = vpop.f32.mrb[9].mxu1  ;;  %v5678_v60 = vpop.f32.mrb[10].mxu0  ;;  %v6674_v54 = vld [vmem:[#allocation5 + $0xa50] sm:$0xff]  }
 0x170   :  { %v5699_v59 = vadd.f32 %v5698_v57, %v5697_v52  ;;  %v5700_v63 = vpop.f32.mrb[10].mxu1  ;;  %v5679_v1 = vpop.f32.mrb[11].mxu0  ;;  %v6675_v57 = vld [vmem:[#allocation5 + $0xad0] sm:$0xff]  }
 0x171   :  { %v3961_v62 = vadd.f32 %v5677_v56, %v6956_v7  ;;  %v5680_v4 = vadd.f32 %v5679_v1, %v5678_v60  ;;  %v5701_v5 = vpop.f32.mrb[11].mxu1  ;;  %v6649_v7 = vld [vmem:[#allocation5 + $0x998] sm:$0xff]   ;;  %v6676_v60 = vld [vmem:[#allocation5 + $0xa10] sm:$0xff]  }
 0x172   :  { %v5702_v8 = vadd.f32 %v5701_v5, %v5700_v63  ;;  %5996 = vmatpush3.bf16.msra.mxu1 %v6649_v7  ;;  %v6679_v5 = vld [vmem:[#allocation5 + $0xad8] sm:$0xff]   ;;  %v6684_v7 = vld [vmem:[#allocation5 + $0xa20] sm:$0xff]  }
 0x173   :  { %v6962_v3 = vadd.f32 %v5699_v59, %v3961_v62  ;;  %v3964_v10 = vadd.f32 %v5680_v4, %v6959_v16  ;;  %5997 = vmatprep.subr.bf16.mxu1 %v6651_v14  ;;  %v6656_v16 = vld [vmem:[#allocation5 + $0x928] sm:$0xff]   ;;  %v6677_v62 = vld [vmem:[#allocation5 + $0xa90] sm:$0xff]  }
 0x174   :  { %5978 = vmatpush3.bf16.msra.mxu0 %v6656_v16  ;;  %v6686_v14 = vld [vmem:[#allocation5 + $0xa68] sm:$0xff]   ;;  %v6692_v16 = vld [vmem:[#allocation5 + $0xa30] sm:$0xff]  }
 0x175   :  { %v6965_v12 = vadd.f32 %v5702_v8, %v3964_v10  ;;  %5979 = vmatprep.subr.bf16.mxu0 %v6658_v21  ;;  %v6680_v8 = vld [vmem:[#allocation5 + $0xa18] sm:$0xff]   ;;  %v6682_v10 = vld [vmem:[#allocation5 + $0xa60] sm:$0xff]  }
 0x176   :  { %5998 = vmatpush3.bf16.msra.mxu1 %v6653_v17  ;;  %v6689_v17 = vld [vmem:[#allocation5 + $0xaa8] sm:$0xff]   ;;  %v6694_v21 = vld [vmem:[#allocation5 + $0xa78] sm:$0xff]  }
 0x177   :  { %5999 = vmatprep.subr.bf16.mxu1 %v6655_v19  ;;  %v6691_v19 = vld [vmem:[#allocation5 + $0xaf0] sm:$0xff]  }
 0x178   :  { %5980 = vmatpush3.bf16.msra.mxu0 %v6660_v23  ;;  %v6696_v23 = vld [vmem:[#allocation5 + $0xa38] sm:$0xff]  }
 0x179   :  { %5981 = vmatprep.subr.bf16.mxu0 %v6662_v25  ;;  %v98_v25 = vld [vmem:[#allocation2 + $0x148] sm:$0xff] }
 0x17a   :  { %6000 = vmatpush3.bf16.msra.mxu1 %v6657_v20  ;;  %v6693_v20 = vld [vmem:[#allocation5 + $0xab0] sm:$0xff]  }
 0x17b   :  { %6001 = vmatprep.subr.bf16.mxu1 %v6659_v22  ;;  %v6695_v22 = vld [vmem:[#allocation5 + $0xaf8] sm:$0xff]  }
 0x17c   :  { %5982 = vmatpush3.bf16.msra.mxu0 %v6664_v27  ;;  %v100_v27 = vld [vmem:[#allocation2 + $0x158] sm:$0xff] }
 0x17d   :  { %6011 = vmatprep.subr.bf16.mxu0 %v6666_v41  ;;  %v212_v32 = vpack.c.bf16 %v156_v29, %v100_v27  ;;  %v6702_v41 = vld [vmem:[#allocation5 + $0xb48] sm:$0xff]   ;;  %v101_v27 = vld [vmem:[#allocation2 + $0x160] sm:$0xff]  ;;  %v103_v29 = vld [vmem:[#allocation2 + $0x170] sm:$0xff] }
 0x17e   :  { %6002 = vmatpush3.bf16.msra.mxu1 %v6661_v24  ;;  %v6697_v24 = vld [vmem:[#allocation5 + $0xab8] sm:$0xff]  }
 0x17f   :  { %6003 = vmatprep.subr.bf16.mxu1 %v6663_v26  ;;  %4533 = vmatmul.mubr.bf16.vlgmr.msra.gmra.mrb[36].mxu0 %v205_v39  ;;  %v154_v26 = vld [vmem:[#allocation2 + $0x308] sm:$0xff]  ;;  %v6700_v39 = vld [vmem:[#allocation5 + $0xb00] sm:$0xff]  }
 0x180   :  { %6012 = vmatpush3.bf16.msra.mxu0 %v6668_v43  ;;  %v6703_v43 = vld [vmem:[#allocation5 + $0xbc8] sm:$0xff]  }
 0x181   :  { %6013 = vmatprep.subr.bf16.mxu0 %v6670_v45  ;;  %v6704_v45 = vld [vmem:[#allocation5 + $0xb08] sm:$0xff]  }
 0x182   :  { %6004 = vmatpush3.bf16.msra.mxu1 %v6665_v28  ;;  %v210_v28 = vpack.c.bf16 %v154_v26, %v98_v25 }
 0x183   :  { %6033 = vmatprep.subr.bf16.mxu1 %v6667_v42 }
 0x184   :  { %6014 = vmatpush3.bf16.msra.mxu0 %v6672_v49  ;;  %4614 = vmatprep.mubr.bf16.mxu0 %v210_v28  ;;  %v157_v28 = vld [vmem:[#allocation2 + $0x320] sm:$0xff] }
 0x185   :  { %4574 = vmatmul.mubr.bf16.vlgmr.msra.gmra.mrb[36].mxu1 %v207_v40  ;;  %6015 = vmatprep.subr.bf16.mxu0 %v6674_v54  ;;  %v6701_v40 = vld [vmem:[#allocation5 + $0xb80] sm:$0xff]   ;;  %v213_v30 = vpack.c.bf16 %v157_v28, %v101_v27 }
 0x186   :  { %6034 = vmatpush3.bf16.msra.mxu1 %v6669_v44  ;;  %4655 = vmatprep.mubr.bf16.mxu1 %v212_v32  ;;  %v215_v32 = vpack.c.bf16 %v159_v31, %v103_v29  ;;  %v6762_v29 = vld [vmem:[#allocation5 + $0xd40] sm:$0xff]  }
 0x187   :  { %6035 = vmatprep.subr.bf16.mxu1 %v6671_v47  ;;  %v6705_v47 = vld [vmem:[#allocation5 + $0xb88] sm:$0xff]   ;;  %v6763_v31 = vld [vmem:[#allocation5 + $0xd00] sm:$0xff]  }
 0x188   :  { %6016 = vmatpush3.bf16.msra.mxu0 %v6676_v60 }
 0x189   :  { %6017 = vmatprep.subr.bf16.mxu0 %v6678_v2 }
 0x18a   :  { %6036 = vmatpush3.bf16.msra.mxu1 %v6673_v51 }
 0x18b   :  { %6037 = vmatprep.subr.bf16.mxu1 %v6675_v57 }
 0x18c   :  { %6018 = vmatpush3.bf16.msra.mxu0 %v6680_v8  ;;  %v6715_v8 = vld [vmem:[#allocation5 + $0xbe0] sm:$0xff]  }
 0x18d   :  { %v5719_v46 = vpop.f32.mrb[12].mxu0  ;;  %6019 = vmatprep.subr.bf16.mxu0 %v6682_v10  ;;  %v6717_v10 = vld [vmem:[#allocation5 + $0xba0] sm:$0xff]  }
 0x18e   :  { %v5741_v48 = vpop.f32.mrb[12].mxu1  ;;  %v5720_v50 = vpop.f32.mrb[13].mxu0  ;;  %6038 = vmatpush3.bf16.msra.mxu1 %v6677_v62  ;;  %v6710_v62 = vld [vmem:[#allocation5 + $0xb58] sm:$0xff]  }
 0x18f   :  { %v5721_v52 = vadd.f32 %v5720_v50, %v5719_v46  ;;  %v5742_v53 = vpop.f32.mrb[13].mxu1  ;;  %v5722_v56 = vpop.f32.mrb[14].mxu0  ;;  %6039 = vmatprep.subr.bf16.mxu1 %v6679_v5  ;;  %v6706_v50 = vld [vmem:[#allocation5 + $0xb50] sm:$0xff]  }
 0x190   :  { %v5743_v55 = vadd.f32 %v5742_v53, %v5741_v48  ;;  %v5744_v59 = vpop.f32.mrb[14].mxu1  ;;  %v5723_v61 = vpop.f32.mrb[15].mxu0  ;;  %6020 = vmatpush3.bf16.msra.mxu0 %v6684_v7  ;;  %v6707_v53 = vld [vmem:[#allocation5 + $0xbd0] sm:$0xff]   ;;  %v6719_v7 = vld [vmem:[#allocation5 + $0xbe8] sm:$0xff]  }
 0x191   :  { %v4043_v58 = vadd.f32 %v5721_v52, %v6962_v3  ;;  %v5724_v0 = vadd.f32 %v5723_v61, %v5722_v56  ;;  %v5745_v1 = vpop.f32.mrb[15].mxu1  ;;  %v6681_v3 = vld [vmem:[#allocation5 + $0xa98] sm:$0xff]   ;;  %6021 = vmatprep.subr.bf16.mxu0 %v6686_v14  ;;  %v6708_v56 = vld [vmem:[#allocation5 + $0xb10] sm:$0xff]  }
 0x192   :  { %v5746_v4 = vadd.f32 %v5745_v1, %v5744_v59  ;;  %6040 = vmatpush3.bf16.msra.mxu1 %v6681_v3  ;;  %v6711_v1 = vld [vmem:[#allocation5 + $0xbd8] sm:$0xff]   ;;  %v6716_v3 = vld [vmem:[#allocation5 + $0xb20] sm:$0xff]   ;;  %v6722_v14 = vld [vmem:[#allocation5 + $0xb70] sm:$0xff]  }
 0x193   :  { %v6968_v63 = vadd.f32 %v5743_v55, %v4043_v58  ;;  %v4046_v6 = vadd.f32 %v5724_v0, %v6965_v12  ;;  %6041 = vmatprep.subr.bf16.mxu1 %v6683_v11  ;;  %v6688_v12 = vld [vmem:[#allocation5 + $0xa28] sm:$0xff]   ;;  %v6709_v58 = vld [vmem:[#allocation5 + $0xb90] sm:$0xff]  }
 0x194   :  { %6022 = vmatpush3.bf16.msra.mxu0 %v6688_v12  ;;  %v6718_v11 = vld [vmem:[#allocation5 + $0xb68] sm:$0xff]   ;;  %v6724_v12 = vld [vmem:[#allocation5 + $0xb30] sm:$0xff]  }
 0x195   :  { %v6971_v9 = vadd.f32 %v5746_v4, %v4046_v6  ;;  %6023 = vmatprep.subr.bf16.mxu0 %v6690_v18  ;;  %v6712_v4 = vld [vmem:[#allocation5 + $0xb18] sm:$0xff]   ;;  %v6714_v6 = vld [vmem:[#allocation5 + $0xb60] sm:$0xff]  }
 0x196   :  { %6042 = vmatpush3.bf16.msra.mxu1 %v6685_v13  ;;  %v6721_v13 = vld [vmem:[#allocation5 + $0xba8] sm:$0xff]   ;;  %v6726_v18 = vld [vmem:[#allocation5 + $0xb78] sm:$0xff]  }
 0x197   :  { %6043 = vmatprep.subr.bf16.mxu1 %v6687_v15  ;;  %v6723_v15 = vld [vmem:[#allocation5 + $0xbf0] sm:$0xff]  }
 0x198   :  { %6024 = vmatpush3.bf16.msra.mxu0 %v6692_v16  ;;  %v6728_v16 = vld [vmem:[#allocation5 + $0xb38] sm:$0xff]  }
 0x199   :  { %6025 = vmatprep.subr.bf16.mxu0 %v6694_v21  ;;  %v102_v21 = vld [vmem:[#allocation2 + $0x168] sm:$0xff] }
 0x19a   :  { %6044 = vmatpush3.bf16.msra.mxu1 %v6689_v17  ;;  %v6725_v17 = vld [vmem:[#allocation5 + $0xbb0] sm:$0xff]  }
 0x19b   :  { %6045 = vmatprep.subr.bf16.mxu1 %v6691_v19  ;;  %v6727_v19 = vld [vmem:[#allocation5 + $0xbf8] sm:$0xff]  }
 0x19c   :  { %6026 = vmatpush3.bf16.msra.mxu0 %v6696_v23  ;;  %v104_v23 = vld [vmem:[#allocation2 + $0x178] sm:$0xff] }
 0x19d   :  { %6055 = vmatprep.subr.bf16.mxu0 %v6698_v37  ;;  %v6734_v37 = vld [vmem:[#allocation5 + $0xc48] sm:$0xff]  }
 0x19e   :  { %6046 = vmatpush3.bf16.msra.mxu1 %v6693_v20  ;;  %v6729_v20 = vld [vmem:[#allocation5 + $0xbb8] sm:$0xff]  }
 0x19f   :  { %6047 = vmatprep.subr.bf16.mxu1 %v6695_v22  ;;  %4615 = vmatmul.mubr.bf16.vlgmr.msra.gmra.mrb[40].mxu0 %v209_v33  ;;  %v158_v22 = vld [vmem:[#allocation2 + $0x328] sm:$0xff]  ;;  %v6730_v33 = vld [vmem:[#allocation5 + $0xc40] sm:$0xff]  }
 0x1a0   :  { %6056 = vmatpush3.bf16.msra.mxu0 %v6700_v39  ;;  %v214_v25 = vpack.c.bf16 %v158_v22, %v102_v21  ;;  %v6735_v39 = vld [vmem:[#allocation5 + $0xcc8] sm:$0xff]   ;;  %v164_v21 = vld [vmem:[#allocation2 + $0x358] sm:$0xff]  ;;  %v105_v22 = vld [vmem:[#allocation2 + $0x180] sm:$0xff] }
 0x1a1   :  { %6057 = vmatprep.subr.bf16.mxu0 %v6702_v41  ;;  %v6736_v41 = vld [vmem:[#allocation5 + $0xc08] sm:$0xff]  }
 0x1a2   :  { %6048 = vmatpush3.bf16.msra.mxu1 %v6697_v24  ;;  %v160_v24 = vld [vmem:[#allocation2 + $0x338] sm:$0xff]  ;;  %4696 = vmatprep.mubr.bf16.mxu0 %v214_v25  ;;  %v107_v25 = vld [vmem:[#allocation2 + $0x190] sm:$0xff] }
 0x1a3   :  { %6077 = vmatprep.subr.bf16.mxu1 %v6699_v38  ;;  %v216_v26 = vpack.c.bf16 %v160_v24, %v104_v23  ;;  %v161_v24 = vld [vmem:[#allocation2 + $0x340] sm:$0xff] }
 0x1a4   :  { %6058 = vmatpush3.bf16.msra.mxu0 %v6704_v45  ;;  %v217_v27 = vpack.c.bf16 %v161_v24, %v105_v22 }
 0x1a5   :  { %4656 = vmatmul.mubr.bf16.vlgmr.msra.gmra.mrb[40].mxu1 %v211_v36  ;;  %6059 = vmatprep.subr.bf16.mxu0 %v6706_v50  ;;  %v6733_v36 = vld [vmem:[#allocation5 + $0xc80] sm:$0xff]  }
 0x1a6   :  { %6078 = vmatpush3.bf16.msra.mxu1 %v6701_v40  ;;  %4737 = vmatprep.mubr.bf16.mxu1 %v216_v26  ;;  %v163_v26 = vld [vmem:[#allocation2 + $0x350] sm:$0xff] }
 0x1a7   :  { %6079 = vmatprep.subr.bf16.mxu1 %v6703_v43  ;;  %v6737_v43 = vld [vmem:[#allocation5 + $0xc88] sm:$0xff]   ;;  %v219_v28 = vpack.c.bf16 %v163_v26, %v107_v25 }
 0x1a8   :  { %6060 = vmatpush3.bf16.msra.mxu0 %v6708_v56 }
 0x1a9   :  { %6061 = vmatprep.subr.bf16.mxu0 %v6710_v62 }
 0x1aa   :  { %6080 = vmatpush3.bf16.msra.mxu1 %v6705_v47 }
 0x1ab   :  { %6081 = vmatprep.subr.bf16.mxu1 %v6707_v53 }
 0x1ac   :  { %6062 = vmatpush3.bf16.msra.mxu0 %v6712_v4  ;;  %v6747_v4 = vld [vmem:[#allocation5 + $0xce0] sm:$0xff]  }
 0x1ad   :  { %v5763_v42 = vpop.f32.mrb[16].mxu0  ;;  %6063 = vmatprep.subr.bf16.mxu0 %v6714_v6  ;;  %v6749_v6 = vld [vmem:[#allocation5 + $0xca0] sm:$0xff]  }
 0x1ae   :  { %v5785_v44 = vpop.f32.mrb[16].mxu1  ;;  %v5764_v46 = vpop.f32.mrb[17].mxu0  ;;  %6082 = vmatpush3.bf16.msra.mxu1 %v6709_v58  ;;  %v6742_v58 = vld [vmem:[#allocation5 + $0xc58] sm:$0xff]  }
 0x1af   :  { %v5765_v48 = vadd.f32 %v5764_v46, %v5763_v42  ;;  %v5786_v49 = vpop.f32.mrb[17].mxu1  ;;  %v5766_v52 = vpop.f32.mrb[18].mxu0  ;;  %6083 = vmatprep.subr.bf16.mxu1 %v6711_v1  ;;  %v6738_v46 = vld [vmem:[#allocation5 + $0xc50] sm:$0xff]  }
 0x1b0   :  { %v5787_v51 = vadd.f32 %v5786_v49, %v5785_v44  ;;  %v5788_v55 = vpop.f32.mrb[18].mxu1  ;;  %v5767_v57 = vpop.f32.mrb[19].mxu0  ;;  %6064 = vmatpush3.bf16.msra.mxu0 %v6716_v3  ;;  %v6739_v49 = vld [vmem:[#allocation5 + $0xcd0] sm:$0xff]   ;;  %v6751_v3 = vld [vmem:[#allocation5 + $0xce8] sm:$0xff]  }
 0x1b1   :  { %v4125_v54 = vadd.f32 %v5765_v48, %v6968_v63  ;;  %v5768_v60 = vadd.f32 %v5767_v57, %v5766_v52  ;;  %v5789_v61 = vpop.f32.mrb[19].mxu1  ;;  %v6713_v63 = vld [vmem:[#allocation5 + $0xb98] sm:$0xff]   ;;  %6065 = vmatprep.subr.bf16.mxu0 %v6718_v11  ;;  %v6740_v52 = vld [vmem:[#allocation5 + $0xc10] sm:$0xff]  }
 0x1b2   :  { %v5790_v0 = vadd.f32 %v5789_v61, %v5788_v55  ;;  %6084 = vmatpush3.bf16.msra.mxu1 %v6713_v63  ;;  %v6743_v61 = vld [vmem:[#allocation5 + $0xcd8] sm:$0xff]   ;;  %v6748_v63 = vld [vmem:[#allocation5 + $0xc20] sm:$0xff]   ;;  %v6754_v11 = vld [vmem:[#allocation5 + $0xc70] sm:$0xff]  }
 0x1b3   :  { %v6974_v59 = vadd.f32 %v5787_v51, %v4125_v54  ;;  %v4128_v2 = vadd.f32 %v5768_v60, %v6971_v9  ;;  %6085 = vmatprep.subr.bf16.mxu1 %v6715_v8  ;;  %v6720_v9 = vld [vmem:[#allocation5 + $0xb28] sm:$0xff]   ;;  %v6741_v54 = vld [vmem:[#allocation5 + $0xc90] sm:$0xff]  }
 0x1b4   :  { %6066 = vmatpush3.bf16.msra.mxu0 %v6720_v9  ;;  %v6750_v8 = vld [vmem:[#allocation5 + $0xc68] sm:$0xff]   ;;  %v6756_v9 = vld [vmem:[#allocation5 + $0xc30] sm:$0xff]  }
 0x1b5   :  { %v6977_v5 = vadd.f32 %v5790_v0, %v4128_v2  ;;  %6067 = vmatprep.subr.bf16.mxu0 %v6722_v14  ;;  %v6744_v0 = vld [vmem:[#allocation5 + $0xc18] sm:$0xff]   ;;  %v6746_v2 = vld [vmem:[#allocation5 + $0xc60] sm:$0xff]  }
 0x1b6   :  { %6086 = vmatpush3.bf16.msra.mxu1 %v6717_v10  ;;  %v6753_v10 = vld [vmem:[#allocation5 + $0xca8] sm:$0xff]   ;;  %v6758_v14 = vld [vmem:[#allocation5 + $0xc78] sm:$0xff]  }
 0x1b7   :  { %6087 = vmatprep.subr.bf16.mxu1 %v6719_v7  ;;  %v6755_v7 = vld [vmem:[#allocation5 + $0xcf0] sm:$0xff]  }
 0x1b8   :  { %6068 = vmatpush3.bf16.msra.mxu0 %v6724_v12  ;;  %v6760_v12 = vld [vmem:[#allocation5 + $0xc38] sm:$0xff]  }
 0x1b9   :  { %6069 = vmatprep.subr.bf16.mxu0 %v6726_v18  ;;  %v106_v18 = vld [vmem:[#allocation2 + $0x188] sm:$0xff] }
 0x1ba   :  { %6088 = vmatpush3.bf16.msra.mxu1 %v6721_v13  ;;  %v6757_v13 = vld [vmem:[#allocation5 + $0xcb0] sm:$0xff]  }
 0x1bb   :  { %6089 = vmatprep.subr.bf16.mxu1 %v6723_v15  ;;  %v6759_v15 = vld [vmem:[#allocation5 + $0xcf8] sm:$0xff]  }
 0x1bc   :  { %6070 = vmatpush3.bf16.msra.mxu0 %v6728_v16 }
 0x1bd   :  { %6099 = vmatprep.subr.bf16.mxu0 %v6730_v33  ;;  %v6765_v33 = vld [vmem:[#allocation5 + $0xd48] sm:$0xff]  }
 0x1be   :  { %6090 = vmatpush3.bf16.msra.mxu1 %v6725_v17  ;;  %v6761_v17 = vld [vmem:[#allocation5 + $0xcb8] sm:$0xff]  }
 0x1bf   :  { %6091 = vmatprep.subr.bf16.mxu1 %v6727_v19  ;;  %4697 = vmatmul.mubr.bf16.vlgmr.msra.gmra.mrb[44].mxu0 %v213_v30  ;;  %v162_v19 = vld [vmem:[#allocation2 + $0x348] sm:$0xff]  ;;  %v6890_v30 = vmov 0  }
 0x1c0   :  { %6100 = vmatpush3.bf16.msra.mxu0 %v6732_v35  ;;  %v218_v16 = vpack.c.bf16 %v162_v19, %v106_v18  ;;  %v167_v18 = vld [vmem:[#allocation2 + $0x370] sm:$0xff] }
 0x1c1   :  { %6101 = vmatprep.subr.bf16.mxu0 %v6734_v37 }
 0x1c2   :  { %6092 = vmatpush3.bf16.msra.mxu1 %v6729_v20  ;;  %v108_v20 = vld [vmem:[#allocation2 + $0x198] sm:$0xff]  ;;  %4778 = vmatprep.mubr.bf16.mxu0 %v218_v16 }
 0x1c3   :  { %6121 = vmatprep.subr.bf16.mxu1 %v6731_v34  ;;  %v220_v23 = vpack.c.bf16 %v164_v21, %v108_v20  ;;  %v6766_v34 = vld [vmem:[#allocation5 + $0xd08] sm:$0xff]  }
 0x1c4   :  { %6102 = vmatpush3.bf16.msra.mxu0 %v6736_v41 }
 0x1c5   :  { %4738 = vmatmul.mubr.bf16.vlgmr.msra.gmra.mrb[44].mxu1 %v215_v32  ;;  %6103 = vmatprep.subr.bf16.mxu0 %v6738_v46  ;;  %v6764_v32 = vld [vmem:[#allocation5 + $0xd80] sm:$0xff]   ;;  %v6771_v46 = vld [vmem:[#allocation5 + $0xd58] sm:$0xff]  }
 0x1c6   :  { %6122 = vmatpush3.bf16.msra.mxu1 %v6733_v36  ;;  %4819 = vmatprep.mubr.bf16.mxu1 %v220_v23  ;;  %v6767_v36 = vld [vmem:[#allocation5 + $0xd88] sm:$0xff]  }
 0x1c7   :  { %6123 = vmatprep.subr.bf16.mxu1 %v6735_v39 }
 0x1c8   :  { %6104 = vmatpush3.bf16.msra.mxu0 %v6740_v52 }
 0x1c9   :  { %6105 = vmatprep.subr.bf16.mxu0 %v6742_v58 }
 0x1ca   :  { %6124 = vmatpush3.bf16.msra.mxu1 %v6737_v43  ;;  %v6770_v43 = vld [vmem:[#allocation5 + $0xd90] sm:$0xff]  }
 0x1cb   :  { %6125 = vmatprep.subr.bf16.mxu1 %v6739_v49 }
 0x1cc   :  { %6106 = vmatpush3.bf16.msra.mxu0 %v6744_v0  ;;  %v6778_v0 = vld [vmem:[#allocation5 + $0xd28] sm:$0xff]  }
 0x1cd   :  { %v5807_v38 = vpop.f32.mrb[20].mxu0  ;;  %6107 = vmatprep.subr.bf16.mxu0 %v6746_v2  ;;  %v6780_v2 = vld [vmem:[#allocation5 + $0xd70] sm:$0xff]  }
 0x1ce   :  { %v5829_v40 = vpop.f32.mrb[20].mxu1  ;;  %v5808_v42 = vpop.f32.mrb[21].mxu0  ;;  %6126 = vmatpush3.bf16.msra.mxu1 %v6741_v54  ;;  %v6773_v54 = vld [vmem:[#allocation5 + $0xd98] sm:$0xff]  }
 0x1cf   :  { %v5809_v44 = vadd.f32 %v5808_v42, %v5807_v38  ;;  %v5830_v45 = vpop.f32.mrb[21].mxu1  ;;  %v5810_v48 = vpop.f32.mrb[22].mxu0  ;;  %6127 = vmatprep.subr.bf16.mxu1 %v6743_v61  ;;  %v6768_v38 = vld [vmem:[#allocation5 + $0xd50] sm:$0xff]  }
 0x1d0   :  { %v5831_v47 = vadd.f32 %v5830_v45, %v5829_v40  ;;  %v5832_v51 = vpop.f32.mrb[22].mxu1  ;;  %v5811_v53 = vpop.f32.mrb[23].mxu0  ;;  %6108 = vmatpush3.bf16.msra.mxu0 %v6748_v63  ;;  %v6769_v40 = vld [vmem:[#allocation5 + $0xd10] sm:$0xff]   ;;  %v110_v63 = vld [vmem:[#allocation2 + $0x1a8] sm:$0xff] }
 0x1d1   :  { %v4207_v50 = vadd.f32 %v5809_v44, %v6974_v59  ;;  %v5812_v56 = vadd.f32 %v5811_v53, %v5810_v48  ;;  %v5833_v57 = vpop.f32.mrb[23].mxu1  ;;  %v6745_v59 = vld [vmem:[#allocation5 + $0xc98] sm:$0xff]   ;;  %6109 = vmatprep.subr.bf16.mxu0 %v6750_v8 }
 0x1d2   :  { %v5834_v60 = vadd.f32 %v5833_v57, %v5832_v51  ;;  %6128 = vmatpush3.bf16.msra.mxu1 %v6745_v59  ;;  %v6774_v57 = vld [vmem:[#allocation5 + $0xd60] sm:$0xff]   ;;  %v6779_v59 = vld [vmem:[#allocation5 + $0xda8] sm:$0xff]   ;;  %v6783_v8 = vld [vmem:[#allocation5 + $0xd78] sm:$0xff]  }
 0x1d3   :  { %v6980_v55 = vadd.f32 %v5831_v47, %v4207_v50  ;;  %v4210_v62 = vadd.f32 %v5812_v56, %v6977_v5  ;;  %6129 = vmatprep.subr.bf16.mxu1 %v6747_v4  ;;  %v6752_v5 = vld [vmem:[#allocation5 + $0xc28] sm:$0xff]   ;;  %v6772_v50 = vld [vmem:[#allocation5 + $0xd18] sm:$0xff]   ;;  %v6781_v4 = vld [vmem:[#allocation5 + $0xd30] sm:$0xff]  }
 0x1d4   :  { %6110 = vmatpush3.bf16.msra.mxu0 %v6752_v5  ;;  %v112_v5 = vld [vmem:[#allocation2 + $0x1b8] sm:$0xff] }
 0x1d5   :  { %v6983_v1 = vadd.f32 %v5834_v60, %v4210_v62  ;;  %6111 = vmatprep.subr.bf16.mxu0 %v6754_v11  ;;  %v6775_v60 = vld [vmem:[#allocation5 + $0xd20] sm:$0xff]   ;;  %v6777_v62 = vld [vmem:[#allocation5 + $0xd68] sm:$0xff]   ;;  %v6784_v11 = vld [vmem:[#allocation5 + $0xd38] sm:$0xff]  }
 0x1d6   :  { %6130 = vmatpush3.bf16.msra.mxu1 %v6749_v6  ;;  %v166_v6 = vld [vmem:[#allocation2 + $0x368] sm:$0xff] }
 0x1d7   :  { %6131 = vmatprep.subr.bf16.mxu1 %v6751_v3  ;;  %v222_v3 = vpack.c.bf16 %v166_v6, %v110_v63 }
 0x1d8   :  { %6112 = vmatpush3.bf16.msra.mxu0 %v6756_v9  ;;  %v6785_v9 = vld [vmem:[#allocation5 + $0xdb8] sm:$0xff]  }
 0x1d9   :  { %6113 = vmatprep.subr.bf16.mxu0 %v6758_v14  ;;  %v165_v14 = vld [vmem:[#allocation2 + $0x360] sm:$0xff] }
 0x1da   :  { %6132 = vmatpush3.bf16.msra.mxu1 %v6753_v10  ;;  %v168_v10 = vld [vmem:[#allocation2 + $0x378] sm:$0xff] }
 0x1db   :  { %6133 = vmatprep.subr.bf16.mxu1 %v6755_v7  ;;  %v224_v7 = vpack.c.bf16 %v168_v10, %v112_v5 }
 0x1dc   :  { %6114 = vmatpush3.bf16.msra.mxu0 %v6760_v12  ;;  %v6786_v12 = vld [vmem:[#allocation5 + $0xdc0] sm:$0xff]  }
 0x1dd   :  { %6143 = vmatprep.subr.bf16.mxu0 %v6762_v29 }
 0x1de   :  { %6134 = vmatpush3.bf16.msra.mxu1 %v6757_v13  ;;  %v109_v13 = vld [vmem:[#allocation2 + $0x1a0] sm:$0xff] }
 0x1df   :  { %6135 = vmatprep.subr.bf16.mxu1 %v6759_v15  ;;  %4779 = vmatmul.mubr.bf16.vlgmr.msra.gmra.mrb[48].mxu0 %v217_v27  ;;  %v221_v15 = vpack.c.bf16 %v165_v14, %v109_v13 }
 0x1e0   :  { %6144 = vmatpush3.bf16.msra.mxu0 %v6763_v31  ;;  %4860 = vmatprep.mubr.bf16.mxu0 %v222_v3 }
 0x1e1   :  { %6145 = vmatprep.subr.bf16.mxu0 %v6765_v33 }
 0x1e2   :  { %6136 = vmatpush3.bf16.msra.mxu1 %v6761_v17  ;;  %v111_v17 = vld [vmem:[#allocation2 + $0x1b0] sm:$0xff] }
 0x1e3   :  { %4869 = vmatprep.subr.bf16.mxu1 %v6890_v30  ;;  %v223_v19 = vpack.c.bf16 %v167_v18, %v111_v17  ;;  %v4922_v18 = vld [vmem:[#allocation7 + $0x58] sm:$0xff] }
 0x1e4   :  { %6146 = vmatpush3.bf16.msra.mxu0 %v6766_v34 }
 0x1e5   :  { %4820 = vmatmul.mubr.bf16.vlgmr.msra.gmra.mrb[48].mxu1 %v219_v28  ;;  %6147 = vmatprep.subr.bf16.mxu0 %v6768_v38 }
 0x1e6   :  { %4870 = vmatpush1.bf16.msra.mxu1 %v6764_v32  ;;  %5568 = vmatprep.mubr.msk.bf16.mxu1 %vm3758_vm0, %v224_v7 }
 0x1e7   :  { %4871 = vmatprep.subr.bf16.mxu1 %v6890_v30 }
 0x1e8   :  { %6148 = vmatpush3.bf16.msra.mxu0 %v6769_v40 }
 0x1e9   :  { %6149 = vmatprep.subr.bf16.mxu0 %v6771_v46 }
 0x1ea   :  { %4872 = vmatpush1.bf16.msra.mxu1 %v6767_v36 }
 0x1eb   :  { %4873 = vmatprep.subr.bf16.mxu1 %v6890_v30 }
 0x1ec   :  { %6150 = vmatpush3.bf16.msra.mxu0 %v6772_v50 }
 0x1ed   :  { %v5851_v35 = vpop.f32.mrb[24].mxu0  ;;  %6151 = vmatprep.subr.bf16.mxu0 %v6774_v57 }
 0x1ee   :  { %v5873_v37 = vpop.f32.mrb[24].mxu1  ;;  %v5852_v39 = vpop.f32.mrb[25].mxu0  ;;  %4874 = vmatpush1.bf16.msra.mxu1 %v6770_v43 }
 0x1ef   :  { %v5853_v41 = vadd.f32 %v5852_v39, %v5851_v35  ;;  %v5874_v42 = vpop.f32.mrb[25].mxu1  ;;  %v5854_v45 = vpop.f32.mrb[26].mxu0  ;;  %4875 = vmatprep.subr.bf16.mxu1 %v6890_v30 }
 0x1f0   :  { %v5875_v44 = vadd.f32 %v5874_v42, %v5873_v37  ;;  %v5876_v48 = vpop.f32.mrb[26].mxu1  ;;  %v5855_v49 = vpop.f32.mrb[27].mxu0  ;;  %6152 = vmatpush3.bf16.msra.mxu0 %v6775_v60  ;;  %v4917_v60 = vld [vmem:[#allocation7 + $0x30] sm:$0xff] }
 0x1f1   :  { %v4289_v47 = vadd.f32 %v5853_v41, %v6980_v55  ;;  %v5856_v52 = vadd.f32 %v5855_v49, %v5854_v45  ;;  %v5877_v53 = vpop.f32.mrb[27].mxu1  ;;  %v6776_v55 = vld [vmem:[#allocation5 + $0xda0] sm:$0xff]   ;;  %6153 = vmatprep.subr.bf16.mxu0 %v6777_v62  ;;  %v4919_v62 = vld [vmem:[#allocation7 + $0x40] sm:$0xff] }
 0x1f2   :  { %v5878_v56 = vadd.f32 %v5877_v53, %v5876_v48  ;;  %4876 = vmatpush1.bf16.msra.mxu1 %v6773_v54  ;;  %v4914_v53 = vld [vmem:[#allocation7 + $0x18] sm:$0xff] }
 0x1f3   :  { %v6989_v51 = vadd.f32 %v5875_v44, %v4289_v47  ;;  %v4292_v58 = vadd.f32 %v5856_v52, %v6983_v1  ;;  %4877 = vmatprep.subr.bf16.mxu1 %v6890_v30  ;;  %v6782_v1 = vld [vmem:[#allocation5 + $0xdb0] sm:$0xff]   ;;  %v4913_v52 = vld [vmem:[#allocation7 + $0x10] sm:$0xff] }
 0x1f4   :  { %6154 = vmatpush3.bf16.msra.mxu0 %v6778_v0 }
 0x1f5   :  { %v6993_v61 = vadd.f32 %v5878_v56, %v4292_v58  ;;  %6155 = vmatprep.subr.bf16.mxu0 %v6780_v2  ;;  %v4915_v56 = vld [vmem:[#allocation7 + $0x20] sm:$0xff]  ;;  %v4916_v58 = vld [vmem:[#allocation7 + $0x28] sm:$0xff]  ;;  %v4921_v2 = vld [vmem:[#allocation7 + $0x50] sm:$0xff] }
 0x1f6   :  { %4878 = vmatpush1.bf16.msra.mxu1 %v6776_v55  ;;  %v6275_v57 = vpack.c.bf16 %v4915_v56, %v4914_v53  ;;  %v4918_v55 = vld [vmem:[#allocation7 + $0x38] sm:$0xff] }
 0x1f7   :  { %4879 = vmatprep.subr.bf16.mxu1 %v6890_v30  ;;  %v6283_v0 = vpack.c.bf16 %v4919_v62, %v4918_v55 }
 0x1f8   :  { %6156 = vmatpush3.bf16.msra.mxu0 %v6781_v4 }
 0x1f9   :  { %6157 = vmatprep.subr.bf16.mxu0 %v6783_v8 }
 0x1fa   :  { %4880 = vmatpush1.bf16.msra.mxu1 %v6779_v59  ;;  %v4920_v59 = vld [vmem:[#allocation7 + $0x48] sm:$0xff] }
 0x1fb   :  { %4881 = vmatprep.subr.bf16.mxu1 %v6890_v30  ;;  %v6287_v4 = vpack.c.bf16 %v4921_v2, %v4920_v59 }
 0x1fc   :  { %6158 = vmatpush3.bf16.msra.mxu0 %v6784_v11 }
 0x1fe   :  { %4882 = vmatpush1.bf16.msra.mxu1 %v6782_v1 }
 0x1ff   :  { %4883 = vmatprep.subr.bf16.mxu1 %v6890_v30  ;;  %4861 = vmatmul.mubr.bf16.vlgmr.msra.gmra.mrb[52].mxu0 %v221_v15 }
 0x202   :  { %4884 = vmatpush1.bf16.msra.mxu1 %v6785_v9 }
 0x203   :  { %4885 = vmatprep.subr.bf16.mxu1 %v6890_v30 }
 0x206   :  { %4886 = vmatpush1.bf16.msra.mxu1 %v6786_v12 }
 0x209   :  { %4902 = vmatmul.mubr.bf16.vlgmr.msra.gmra.mrb[52].mxu1 %v223_v19  ;;  %v4923_v19 = vld [vmem:[#allocation7 + $0x60] sm:$0xff] }
 0x20d   :  { %v5895_v16 = vpop.f32.mrb[28].mxu0 }
 0x20e   :  { %v5917_v20 = vpop.f32.mrb[28].mxu1  ;;  %v5896_v21 = vpop.f32.mrb[29].mxu0 }
 0x20f   :  { %v5897_v22 = vadd.f32 %v5896_v21, %v5895_v16  ;;  %v5918_v23 = vpop.f32.mrb[29].mxu1  ;;  %v5898_v24 = vpop.f32.mrb[30].mxu0  ;;  %v6291_v16 = vpack.c.bf16 %v4923_v19, %v4922_v18  ;;  %v4924_v21 = vld [vmem:[#allocation7 + $0x68] sm:$0xff] }
 0x210   :  { %v5919_v25 = vadd.f32 %v5918_v23, %v5917_v20  ;;  %v5920_v26 = vpop.f32.mrb[30].mxu1  ;;  %v5899_v27 = vpop.f32.mrb[31].mxu0 }
 0x211   :  { %v4371_v28 = vadd.f32 %v5897_v22, %v6989_v51  ;;  %v5900_v29 = vadd.f32 %v5899_v27, %v5898_v24  ;;  %v5921_v31 = vpop.f32.mrb[31].mxu1  ;;  %v4912_v51 = vld [vmem:[#allocation7 + $0x8] sm:$0xff]  ;;  %v4925_v22 = vld [vmem:[#allocation7 + $0x70] sm:$0xff]  ;;  %v4926_v24 = vld [vmem:[#allocation7 + $0x78] sm:$0xff] }
 0x212   :  { %v5922_v32 = vadd.f32 %v5921_v31, %v5920_v26  ;;  %v6271_v54 = vpack.c.bf16 %v4913_v52, %v4912_v51  ;;  %v6295_v23 = vpack.c.bf16 %v4925_v22, %v4924_v21  ;;  %v5010_v27 = vld [vmem:[#allocation7 + $0x90] sm:$0xff] }
 0x213   :  { %v4412_v33 = vadd.f32 %v5919_v25, %v4371_v28  ;;  %v4374_v30 = vadd.f32 %v5900_v29, %v6993_v61  ;;  %v6279_v61 = vpack.c.bf16 %v4917_v60, %v4916_v58  ;;  %v4927_v25 = vld [vmem:[#allocation7 + $0x80] sm:$0xff]  ;;  %v5011_v28 = vld [vmem:[#allocation7 + $0x98] sm:$0xff]  ;;  %v5022_v60 = vld [vmem:[#allocation7 + $0xf0] sm:$0xff] }
 0x214   :  { %6272 = vmatprep.subr.bf16.mxu0 %v6271_v54  ;;  %v6299_v26 = vpack.c.bf16 %v4927_v25, %v4926_v24  ;;  %v5012_v29 = vld [vmem:[#allocation7 + $0xa0] sm:$0xff]  ;;  %v6303_v31 = vpack.c.bf16 %v5011_v28, %v5010_v27 }
 0x215   :  { %v4415_v34 = vadd.f32 %v5922_v32, %v4374_v30  ;;  %6274 = vmatpush3.bf16.msra.mxu0 %v6271_v54  ;;  %v5013_v32 = vld [vmem:[#allocation7 + $0xa8] sm:$0xff]  ;;  %v5014_v30 = vld [vmem:[#allocation7 + $0xb0] sm:$0xff] }
 0x216   :  { %6276 = vmatprep.subr.bf16.mxu0 %v6275_v57  ;;  %6304 = vmatprep.subr.bf16.mxu1 %v6303_v31 }
 0x217   :  { %6306 = vmatpush3.bf16.msra.mxu1 %v6303_v31 }
 0x219   :  { %6278 = vmatpush3.bf16.msra.mxu0 %v6275_v57 }
 0x21a   :  { %6280 = vmatprep.subr.bf16.mxu0 %v6279_v61 }
 0x21d   :  { %6282 = vmatpush3.bf16.msra.mxu0 %v6279_v61  ;;  %v5023_v61 = vld [vmem:[#allocation7 + $0xf8] sm:$0xff] }
 0x21e   :  { %6284 = vmatprep.subr.bf16.mxu0 %v6283_v0  ;;  %v6327_v59 = vpack.c.bf16 %v5023_v61, %v5022_v60  ;;  %v5570_v60 = vld [vmem:[#allocation7 + $0x110] ss:$0 sm:$0xff] }
 0x221   :  { %6286 = vmatpush3.bf16.msra.mxu0 %v6283_v0 }
 0x222   :  { %6288 = vmatprep.subr.bf16.mxu0 %v6287_v4 }
 0x225   :  { %6290 = vmatpush3.bf16.msra.mxu0 %v6287_v4 }
 0x226   :  { %6292 = vmatprep.subr.bf16.mxu0 %v6291_v16 }
 0x229   :  { %6294 = vmatpush3.bf16.msra.mxu0 %v6291_v16 }
 0x22a   :  { %6296 = vmatprep.subr.bf16.mxu0 %v6295_v23 }
 0x22d   :  { %6298 = vmatpush3.bf16.msra.mxu0 %v6295_v23 }
 0x22e   :  { %v5939_v35 = vpop.f32.mrb[32].mxu0  ;;  %v5961_v36 = vpop.f32.mrb[32].mxu1  ;;  %6300 = vmatprep.subr.bf16.mxu0 %v6299_v26 }
 0x22f   :  { %v5940_v37 = vpop.f32.mrb[33].mxu0  ;;  %v5962_v39 = vpop.f32.mrb[33].mxu1 }
 0x230   :  { %v5941_v38 = vadd.f32 %v5940_v37, %v5939_v35  ;;  %v5942_v40 = vpop.f32.mrb[34].mxu0  ;;  %v5963_v41 = vadd.f32 %v5962_v39, %v5961_v36  ;;  %v5964_v42 = vpop.f32.mrb[34].mxu1  ;;  %v5016_v36 = vld [vmem:[#allocation7 + $0xc0] sm:$0xff]  ;;  %v5017_v37 = vld [vmem:[#allocation7 + $0xc8] sm:$0xff]  ;;  %v5018_v39 = vld [vmem:[#allocation7 + $0xd0] sm:$0xff] }
 0x231   :  { %v5943_v43 = vpop.f32.mrb[35].mxu0  ;;  %v5965_v46 = vpop.f32.mrb[35].mxu1  ;;  %6302 = vmatpush3.bf16.msra.mxu0 %v6299_v26 }
 0x232   :  { %v4453_v44 = vadd.f32 %v5941_v38, %v4412_v33  ;;  %v5944_v45 = vadd.f32 %v5943_v43, %v5942_v40  ;;  %v5966_v47 = vadd.f32 %v5965_v46, %v5964_v42  ;;  %v6307_v33 = vpack.c.bf16 %v5013_v32, %v5012_v29  ;;  %v5019_v40 = vld [vmem:[#allocation7 + $0xd8] sm:$0xff]  ;;  %v5021_v46 = vld [vmem:[#allocation7 + $0xe8] sm:$0xff] }
 0x233   :  { %v6315_v38 = vpack.c.bf16 %v5017_v37, %v5016_v36  ;;  %v6319_v42 = vpack.c.bf16 %v5019_v40, %v5018_v39 }
 0x234   :  { %v4494_v48 = vadd.f32 %v5963_v41, %v4453_v44  ;;  %v4456_v49 = vadd.f32 %v5944_v45, %v4415_v34  ;;  %v5015_v34 = vld [vmem:[#allocation7 + $0xb8] sm:$0xff]  ;;  %6308 = vmatprep.subr.bf16.mxu1 %v6307_v33  ;;  %v5020_v45 = vld [vmem:[#allocation7 + $0xe0] sm:$0xff] }
 0x235   :  { %v6311_v35 = vpack.c.bf16 %v5015_v34, %v5014_v30  ;;  %6310 = vmatpush3.bf16.msra.mxu1 %v6307_v33  ;;  %v6323_v57 = vpack.c.bf16 %v5021_v46, %v5020_v45 }
 0x236   :  { %v4497_v50 = vadd.f32 %v5966_v47, %v4456_v49 }
 0x237   :  { %6312 = vmatprep.subr.bf16.mxu1 %v6311_v35 }
 0x239   :  { %6314 = vmatpush3.bf16.msra.mxu1 %v6311_v35 }
 0x23a   :  { %6316 = vmatprep.subr.bf16.mxu1 %v6315_v38 }
 0x23d   :  { %6318 = vmatpush3.bf16.msra.mxu1 %v6315_v38 }
 0x23e   :  { %6320 = vmatprep.subr.bf16.mxu1 %v6319_v42 }
 0x241   :  { %6322 = vmatpush3.bf16.msra.mxu1 %v6319_v42 }
 0x242   :  { %6324 = vmatprep.subr.bf16.mxu1 %v6323_v57 }
 0x245   :  { %6326 = vmatpush3.bf16.msra.mxu1 %v6323_v57 }
 0x246   :  { %6328 = vmatprep.subr.bf16.mxu1 %v6327_v59 }
 0x249   :  { %6330 = vmatpush3.bf16.msra.mxu1 %v6327_v59 }
 0x252   :  { %v5983_v1 = vpop.f32.mrb[36].mxu0 }
 0x253   :  { %v5984_v6 = vpop.f32.mrb[37].mxu0 }
 0x254   :  { %v5985_v3 = vadd.f32 %v5984_v6, %v5983_v1  ;;  %v5986_v10 = vpop.f32.mrb[38].mxu0 }
 0x255   :  { %v5987_v7 = vpop.f32.mrb[39].mxu0 }
 0x256   :  { %v4535_v13 = vadd.f32 %v5985_v3, %v4494_v48  ;;  %v5988_v14 = vadd.f32 %v5987_v7, %v5986_v10 }
 0x258   :  { %v6005_v63 = vpop.f32.mrb[36].mxu1  ;;  %v4538_v17 = vadd.f32 %v5988_v14, %v4497_v50 }
 0x259   :  { %v6006_v8 = vpop.f32.mrb[37].mxu1 }
 0x25a   :  { %v6007_v5 = vadd.f32 %v6006_v8, %v6005_v63  ;;  %v6008_v11 = vpop.f32.mrb[38].mxu1 }
 0x25b   :  { %v6009_v9 = vpop.f32.mrb[39].mxu1 }
 0x25c   :  { %v6010_v15 = vadd.f32 %v6009_v9, %v6008_v11  ;;  %v4576_v12 = vadd.f32 %v6007_v5, %v4535_v13 }
 0x25e   :  { %v4579_v20 = vadd.f32 %v6010_v15, %v4538_v17 }
 0x272   :  { %v6027_v41 = vpop.f32.mrb[40].mxu0 }
 0x273   :  { %v6028_v44 = vpop.f32.mrb[41].mxu0 }
 0x274   :  { %v6029_v47 = vadd.f32 %v6028_v44, %v6027_v41  ;;  %v6030_v49 = vpop.f32.mrb[42].mxu0 }
 0x275   :  { %v6031_v52 = vpop.f32.mrb[43].mxu0 }
 0x276   :  { %v4617_v53 = vadd.f32 %v6029_v47, %v4576_v12  ;;  %v6032_v54 = vadd.f32 %v6031_v52, %v6030_v49  ;;  %v5025_v49 = vld [vmem:[#allocation7 + $0x108] sm:$0xff] }
 0x278   :  { %v6049_v43 = vpop.f32.mrb[40].mxu1  ;;  %v4620_v62 = vadd.f32 %v6032_v54, %v4579_v20 }
 0x279   :  { %v6050_v48 = vpop.f32.mrb[41].mxu1 }
 0x27a   :  { %v6051_v50 = vadd.f32 %v6050_v48, %v6049_v43  ;;  %v6052_v51 = vpop.f32.mrb[42].mxu1  ;;  %v5024_v48 = vld [vmem:[#allocation7 + $0x100] sm:$0xff] }
 0x27b   :  { %v6053_v56 = vpop.f32.mrb[43].mxu1 }
 0x27c   :  { %v6054_v58 = vadd.f32 %v6053_v56, %v6052_v51  ;;  %v4658_v55 = vadd.f32 %v6051_v50, %v4617_v53  ;;  %v6331_v50 = vpack.c.bf16 %v5025_v49, %v5024_v48  ;;  %v5569_v51 = vld [vmem:[#allocation7 + $0x88] ss:$0 sm:$0xff] }
 0x27e   :  { %v4661_v0 = vadd.f32 %v6054_v58, %v4620_v62  ;;  %6332 = vmatprep.subr.bf16.mxu1 %v6331_v50 }
 0x27f   :  { %6334 = vmatpush3.bf16.msra.mxu1 %v6331_v50 }
 0x292   :  { %v6071_v2 = vpop.f32.mrb[44].mxu0 }
 0x293   :  { %v6072_v1 = vpop.f32.mrb[45].mxu0 }
 0x294   :  { %v6073_v63 = vadd.f32 %v6072_v1, %v6071_v2  ;;  %v6074_v8 = vpop.f32.mrb[46].mxu0 }
 0x295   :  { %v6075_v10 = vpop.f32.mrb[47].mxu0 }
 0x296   :  { %v4699_v11 = vadd.f32 %v6073_v63, %v4658_v55  ;;  %v6076_v7 = vadd.f32 %v6075_v10, %v6074_v8 }
 0x298   :  { %v6093_v4 = vpop.f32.mrb[44].mxu1  ;;  %v4702_v15 = vadd.f32 %v6076_v7, %v4661_v0 }
 0x299   :  { %v6094_v6 = vpop.f32.mrb[45].mxu1 }
 0x29a   :  { %v6095_v3 = vadd.f32 %v6094_v6, %v6093_v4  ;;  %v6096_v5 = vpop.f32.mrb[46].mxu1 }
 0x29b   :  { %v6097_v9 = vpop.f32.mrb[47].mxu1 }
 0x29c   :  { %v6098_v13 = vadd.f32 %v6097_v9, %v6096_v5  ;;  %v4740_v14 = vadd.f32 %v6095_v3, %v4699_v11 }
 0x29e   :  { %v4743_v12 = vadd.f32 %v6098_v13, %v4702_v15 }
 0x2b2   :  { %v6115_v17 = vpop.f32.mrb[48].mxu0 }
 0x2b3   :  { %v6116_v19 = vpop.f32.mrb[49].mxu0 }
 0x2b4   :  { %v6117_v20 = vadd.f32 %v6116_v19, %v6115_v17  ;;  %v6118_v22 = vpop.f32.mrb[50].mxu0 }
 0x2b5   :  { %v6119_v24 = vpop.f32.mrb[51].mxu0 }
 0x2b6   :  { %v4781_v26 = vadd.f32 %v6117_v20, %v4740_v14  ;;  %v6120_v27 = vadd.f32 %v6119_v24, %v6118_v22 }
 0x2b8   :  { %v6137_v18 = vpop.f32.mrb[48].mxu1  ;;  %v4784_v31 = vadd.f32 %v6120_v27, %v4743_v12 }
 0x2b9   :  { %v6138_v16 = vpop.f32.mrb[49].mxu1 }
 0x2ba   :  { %v6139_v21 = vadd.f32 %v6138_v16, %v6137_v18  ;;  %v6140_v23 = vpop.f32.mrb[50].mxu1 }
 0x2bb   :  { %v6141_v25 = vpop.f32.mrb[51].mxu1 }
 0x2bc   :  { %v6142_v28 = vadd.f32 %v6141_v25, %v6140_v23  ;;  %v4822_v29 = vadd.f32 %v6139_v21, %v4781_v26 }
 0x2be   :  { %v4825_v32 = vadd.f32 %v6142_v28, %v4784_v31 }
 0x2d2   :  { %v6159_v33 = vpop.f32.mrb[52].mxu0 }
 0x2d3   :  { %v6160_v30 = vpop.f32.mrb[53].mxu0 }
 0x2d4   :  { %v6161_v34 = vadd.f32 %v6160_v30, %v6159_v33  ;;  %v6162_v35 = vpop.f32.mrb[54].mxu0 }
 0x2d5   :  { %v6163_v36 = vpop.f32.mrb[55].mxu0 }
 0x2d6   :  { %v6164_v37 = vadd.f32 %v6163_v36, %v6162_v35  ;;  %v4863_v38 = vadd.f32 %v6161_v34, %v4822_v29 }
 0x2d8   :  { %v4866_v42 = vadd.f32 %v6164_v37, %v4825_v32 }
 0x2dc   :  { %v4903_v39 = vpop.f32.mrb[52].mxu1 }
 0x2dd   :  { %v4905_v40 = vpop.f32.mrb[53].mxu1  ;;  %v4904_v41 = vadd.f32 %v4903_v39, %v4863_v38 }
 0x2de   :  { %v4906_v43 = vpop.f32.mrb[54].mxu1 }
 0x2df   :  { %v4908_v44 = vpop.f32.mrb[55].mxu1  ;;  %v4910_v45 = vmax.f32 %v4904_v41, 0.0  ;;  %v4907_v46 = vadd.f32 %v4906_v43, %v4866_v42 }
 0x2e1   :  { %v4911_v47 = vmax.f32 %v4907_v46, 0.0  ;;  %6233 = vmatprep.mubr.f32.mxu0 %v4910_v45 }
 0x2e3   :  { %6234 = vmatmul.mubr.f32.vlgmr.msra.gmra.mrb[56].mxu0 %v4911_v47 }
 0x3b6   :  { %v6235_v52 = vpop.f32.mrb[56].mxu0 }
 0x3b7   :  { %v5005_v53 = vadd.f32 %v6235_v52, %v5569_v51  ;;  %v4999_v54 = vpop.f32.mrb[57].mxu0 }
 0x3b8   :  { %v5000_v56 = vadd.f32 %v5569_v51, %v4999_v54 }
 0x3b9   :  { %v5009_v58 = vmax.f32 %v5005_v53, 0.0 }
 0x3ba   :  { %v5008_v57 = vmax.f32 %v5000_v56, 0.0 }
 0x3bc   :  { %6268 = vmatprep.mubr.f32.mxu1 %v5008_v57 }
 0x3bd   :  { %6269 = vmatmul.mubr.f32.vlgmr.msra.gmra.mrb[56].mxu1 %v5009_v58 }
 0x490   :  { %v6270_v61 = vpop.f32.mrb[56].mxu1 }
 0x491   :  { %v5103_v55 = vadd.f32 %v6270_v61, %v5570_v60  ;;  %v5097_v62 = vpop.f32.mrb[57].mxu1 }
 0x492   :  { %v5098_v0 = vadd.f32 %v5570_v60, %v5097_v62 }
 0x493   :  { %5107 = vst [vmem:[#allocation8 + $0x8] sm:$0xff] %v5103_v55 }
 0x494   :  { %5106 = vst [vmem:[#allocation8] sm:$0xff] %v5098_v0 }
 0x495   :  { %6864 = shalt.err (!%p6861_p0)
}
 0x496   :  { %s6865_s29 = scalar_lea.hbm %s7020_s3, 256 }
 0x497   :  { %p6866_p1 = scmp.ne.s32.totalorder %s7020_s3, %s6865_s29  ;;  %p6869_p2 = scmp.lt.u32.totalorder %s6865_s29, %s7020_s3 }
 0x499   :  { %p6871_p3 = pnand %p6869_p2, %p6866_p1 }
 0x49b   :  { %6874 = shalt.err (!%p6871_p3)
}
 0x49c   :  { %5119 = dma.vmem_to_hbm [thread:$0]  %s5114_s25, 256, %s7020_s3, [#allocation4], %s6888_s0, %s6888_s0, %s6889_s22  }
 0x49d   :  { %6879 = dma.done.wait [#allocation4], 256  }
 0x49e   :  { %6880 = vsyncadd [#allocation4], 4294967040 }
 0x49f   :  { %5123 = vsyncpa [#allocation3], 1 }
 0x4a0   :  { %5124 = vsyncpa [#allocation6], 1 }
 0x4a1   :  { %5125 = vsyncpa [#allocation4], 1 }

</bundles_post_ra>
